<compile_context>
chip_gen: v5e
topology: v5e:2x2
jax: 0.10.0
libtpu: 0.0.40
codegen_flags: <defaults>
</compile_context>

<pallas_src>
import functools

import jax
import jax.numpy as jnp
from jax.experimental import pallas as pl
from jax.experimental.pallas import tpu as pltpu

C_GELU = 0.7978845608028654  # sqrt(2/pi)


def _vmem_limit():
    """Scoped-VMEM limit: most of the chip's VMEM minus headroom for
    compiler-internal scratch.  ~100 MiB on v5e/v6e (128 MiB physical),
    ~48 MiB on v7x (64 MiB physical).  Falls back to 48 MiB if the query
    is unavailable."""
    try:
        cap = pltpu.get_tpu_info().vmem_capacity_bytes
        return int(min(cap - 16 * 1024 * 1024, 100 * 1024 * 1024))
    except Exception:
        return 48 * 1024 * 1024


VMEM_LIMIT = _vmem_limit()


def _round_up(x, m):
    return (x + m - 1) // m * m


def _pick_tile(m, tm_max):
    """Largest row tile (multiple of 8, <= tm_max) dividing m; else pad m up."""
    tm = min(tm_max, _round_up(m, 8))
    for cand in range(tm, 7, -8):
        if m % cand == 0:
            return cand, m
    return tm, _round_up(m, tm)


def _gelu(x):
    # tanh-approx GELU: one EUP tanh + a few VALU ops (cheap epilogue).
    # TODO(synk): torch nn.GELU() defaults to the exact erf form; the tanh
    # approximation differs by ~1e-3, below the bf16 resolution used here.
    return 0.5 * x * (1.0 + jnp.tanh(C_GELU * (x + 0.044715 * x * x * x)))


# ----------------------------------------------------------------------------
# Pallas kernels
# ----------------------------------------------------------------------------
def _mm_gelu_bn_kernel(x_ref, w_ref, b_ref, scale_ref, shift_ref, o_ref):
    y = jnp.dot(x_ref[...], w_ref[...], preferred_element_type=jnp.float32)
    y = _gelu(y + b_ref[...])
    o_ref[...] = (y * scale_ref[...] + shift_ref[...]).astype(o_ref.dtype)


def _mm_bias_kernel(x_ref, w_ref, b_ref, o_ref):
    y = jnp.dot(x_ref[...], w_ref[...], preferred_element_type=jnp.float32)
    o_ref[...] = (y + b_ref[...]).astype(o_ref.dtype)


def _conv_taps_kernel(k, wpad, x_ref, w_ref, b_ref, scale_ref, shift_ref, o_ref):
    """Whole k x k 'same' convolution for one image (grid = (B,)).

    x_ref:  (1, lin, C)   zero-padded flattened activation slab (bf16)
    w_ref:  (k*k, C, C)   all tap weights, VMEM-resident (bf16)
    o_ref:  (1, mrows, C) output in the W-padded "window" layout (bf16)

    Every tap is a static row shift of the slab; the k*k tap matmuls are
    unrolled in Python (static offsets, no per-tap grid step / acc RMW), the
    residual is the center-tap window itself, and the GELU + fused-BN +
    residual epilogue runs once in f32 with a single lane-dense bf16 store.
    """
    _, mrows, _ = o_ref.shape
    pad = k // 2
    center = pad * wpad + pad

    acc = None
    res = None
    for t in range(k * k):
        dh, dw = divmod(t, k)
        off = dh * wpad + dw                       # static; dh*wpad is 8-aligned
        win = x_ref[0, pl.ds(off, mrows), :]       # (mrows, C) bf16
        if off == center:
            res = win                              # residual = original pixels
        d = jnp.dot(win, w_ref[t], preferred_element_type=jnp.float32)
        acc = d if acc is None else acc + d

    y = _gelu(acc + b_ref[...])
    y = y * scale_ref[...] + shift_ref[...]
    o_ref[0] = (y + res.astype(jnp.float32)).astype(o_ref.dtype)


# ----------------------------------------------------------------------------
# Pallas wrappers
# ----------------------------------------------------------------------------
def fused_matmul_gelu_bn(x, w, b, scale, shift, tm=1024):
    """out = scale * gelu(x @ w + b) + shift, row-tiled, bf16 in / bf16 out."""
    M, K = x.shape
    _, N = w.shape
    tm_eff, Mp = _pick_tile(M, tm)
    if Mp != M:
        x = jnp.pad(x, ((0, Mp - M), (0, 0)))

    out = pl.pallas_call(
        _mm_gelu_bn_kernel,
        out_shape=jax.ShapeDtypeStruct((Mp, N), jnp.bfloat16),
        grid=(Mp // tm_eff,),
        in_specs=[
            pl.BlockSpec((tm_eff, K), lambda i: (i, 0)),   # activations: row tiles
            pl.BlockSpec((K, N), lambda i: (0, 0)),        # weights: resident
            pl.BlockSpec((1, N), lambda i: (0, 0)),        # bias (f32)
            pl.BlockSpec((1, N), lambda i: (0, 0)),        # bn scale (f32)
            pl.BlockSpec((1, N), lambda i: (0, 0)),        # bn shift (f32)
        ],
        out_specs=pl.BlockSpec((tm_eff, N), lambda i: (i, 0)),
        compiler_params=pltpu.CompilerParams(
            dimension_semantics=("parallel",),
            vmem_limit_bytes=VMEM_LIMIT),
    )(x.astype(jnp.bfloat16), w.astype(jnp.bfloat16),
      b.reshape(1, N).astype(jnp.float32),
      scale.reshape(1, N).astype(jnp.float32),
      shift.reshape(1, N).astype(jnp.float32))
    return out[:M] if Mp != M else out


def matmul_bias(x, w, b, tm=256):
    """out = x @ w + b (classifier head), f32 in / f32 out."""
    M, K = x.shape
    _, N = w.shape
    tm_eff, Mp = _pick_tile(M, tm)
    xp = jnp.pad(x, ((0, Mp - M), (0, 0))) if Mp != M else x

    out = pl.pallas_call(
        _mm_bias_kernel,
        out_shape=jax.ShapeDtypeStruct((Mp, N), jnp.float32),
        grid=(Mp // tm_eff,),
        in_specs=[
            pl.BlockSpec((tm_eff, K), lambda i: (i, 0)),
            pl.BlockSpec((K, N), lambda i: (0, 0)),
            pl.BlockSpec((1, N), lambda i: (0, 0)),
        ],
        out_specs=pl.BlockSpec((tm_eff, N), lambda i: (i, 0)),
        compiler_params=pltpu.CompilerParams(
            dimension_semantics=("parallel",),
            vmem_limit_bytes=VMEM_LIMIT),
    )(xp.astype(jnp.float32), w.astype(jnp.float32),
      b.reshape(1, N).astype(jnp.float32))
    return out[:M]


def depthconv_gelu_bn_residual(x, w_taps, bias, scale, shift, k, wp):
    """bn1(gelu(conv_kxk_same(x_valid))) + x_valid, via in-kernel tap unroll.

    x:      (B, Hp, Win, C) NHWC; only columns [0, wp) carry valid data (Win
            may include zero/junk W-padding columns from the previous layer).
    w_taps: (k*k, C, C) with w_taps[dh*k+dw, ci, co].
    Returns (B, Hp, Wpad, C) in the W-padded "window" layout: columns [0, wp)
    hold the result, columns [wp, Wpad) are junk and must never be read as
    valid data downstream.
    """
    B, Hp, _, C = x.shape
    pad = k // 2
    # Wpad a multiple of 8 so every dh*Wpad tap shift is sublane-aligned.
    wpad = _round_up(wp + 2 * pad, 8)
    mrows = Hp * wpad
    lin = (Hp + 2 * pad + 1) * wpad       # +1 H row covers the largest tap shift

    # Single pad per layer: drop junk columns, zero-pad H/W, flatten to a slab.
    xp = jnp.pad(x[:, :, :wp, :],
                 ((0, 0), (pad, pad + 1), (pad, wpad - wp - pad), (0, 0)))
    xf = xp.reshape(B, lin, C)

    kernel = functools.partial(_conv_taps_kernel, k, wpad)
    out = pl.pallas_call(
        kernel,
        out_shape=jax.ShapeDtypeStruct((B, mrows, C), jnp.bfloat16),
        grid=(B,),
        in_specs=[
            pl.BlockSpec((1, lin, C), lambda b: (b, 0, 0)),    # slab per image
            # TODO(synk): for C >= ~1024 with k = 9 the resident tap weights
            # (k*k*C*C bf16) exceed v7x's 64 MiB VMEM; fall back there to
            # streamed tap groups or batch-blocked images per grid step.
            pl.BlockSpec((k * k, C, C), lambda b: (0, 0, 0)),  # all taps resident
            pl.BlockSpec((1, C), lambda b: (0, 0)),            # bias (f32)
            pl.BlockSpec((1, C), lambda b: (0, 0)),            # bn scale (f32)
            pl.BlockSpec((1, C), lambda b: (0, 0)),            # bn shift (f32)
        ],
        out_specs=pl.BlockSpec((1, mrows, C), lambda b: (b, 0, 0)),
        compiler_params=pltpu.CompilerParams(
            dimension_semantics=("parallel",),
            vmem_limit_bytes=VMEM_LIMIT),
    )(xf.astype(jnp.bfloat16), w_taps.astype(jnp.bfloat16),
      bias.reshape(1, C).astype(jnp.float32),
      scale.reshape(1, C).astype(jnp.float32),
      shift.reshape(1, C).astype(jnp.float32))

    return out.reshape(B, Hp, wpad, C)


# ----------------------------------------------------------------------------
# Glue: patch extraction / BN fusion (plain JAX, not the hot path)
# ----------------------------------------------------------------------------
def extract_patches_embed(x_nchw, p):
    """Non-overlapping p x p patches, flattened in (c, dh, dw) order
    (matches torch Conv2d weight.reshape(Cout, Cin*p*p))."""
    B, C, H, W = x_nchw.shape
    Hp, Wp = H // p, W // p
    x = x_nchw.reshape(B, C, Hp, p, Wp, p)
    x = x.transpose(0, 2, 4, 1, 3, 5)            # (B, Hp, Wp, C, p, p)
    return x.reshape(B * Hp * Wp, C * p * p), (B, Hp, Wp)


def bn_fuse(gamma, beta, mean, var, eps=1e-5):
    # TODO(synk): BatchNorm implemented in inference mode (fused per-channel
    # affine from running stats); a freshly-constructed torch module in
    # .train() mode would normalize with per-batch statistics instead.
    scale = gamma / jnp.sqrt(var + eps)
    shift = beta - mean * scale
    return scale, shift


# ----------------------------------------------------------------------------
# Parameter initialization (deterministic, synthetic)
# ----------------------------------------------------------------------------
def _bn_params(k, c):
    k1, k2, k3, k4 = jax.random.split(k, 4)
    gamma = jax.random.uniform(k1, (c,), jnp.float32, 0.8, 1.2)
    beta = jax.random.normal(k2, (c,), jnp.float32) * 0.05
    mean = jax.random.normal(k3, (c,), jnp.float32) * 0.05
    var = jax.random.uniform(k4, (c,), jnp.float32, 0.8, 1.2)
    return (gamma, beta, mean, var)


def init_params(key, in_channels, hidden, num_classes, nlayer, patch_size, kernel_size):
    keys = jax.random.split(key, 6 + nlayer)

    def w(k, shape, s=0.05):
        return jax.random.normal(k, shape, jnp.float32) * s

    p, k = patch_size, kernel_size
    params = {}
    # emb_conv: torch weight (hidden, Cin, p, p) -> (Cin*p*p, hidden)
    emb_w_t = w(keys[0], (hidden, in_channels, p, p))
    params["emb_w"] = emb_w_t.reshape(hidden, in_channels * p * p).T
    params["emb_b"] = w(keys[1], (hidden,))
    params["bn"] = _bn_params(keys[2], hidden)

    layers = []
    for i in range(nlayer):
        lk = jax.random.split(keys[3 + i], 6)
        # "depthconv" is a full dense Conv2d per the reference (groups=1):
        # torch weight (Cout, Cin, k, k) -> per-tap (k*k, Cin, Cout), t = dh*k+dw.
        dw_t = w(lk[0], (hidden, hidden, k, k))
        dw_w = dw_t.transpose(2, 3, 1, 0).reshape(k * k, hidden, hidden)
        # pointconv 1x1: torch weight (C, C, 1, 1) -> (Cin, Cout)
        pw_t = w(lk[1], (hidden, hidden, 1, 1))
        pw_w = pw_t.reshape(hidden, hidden).T
        layers.append({
            "dw_w": dw_w, "dw_b": w(lk[2], (hidden,)),
            "bn1": _bn_params(lk[3], hidden),
            "pw_w": pw_w, "pw_b": w(lk[4], (hidden,)),
            "bn2": _bn_params(lk[5], hidden),
        })
    params["layers"] = layers

    # fc: torch Linear weight (num_classes, hidden) -> (hidden, num_classes)
    fc_t = w(keys[3 + nlayer], (num_classes, hidden))
    params["fc_w"] = fc_t.T
    params["fc_b"] = w(keys[4 + nlayer], (num_classes,))
    return params


# ----------------------------------------------------------------------------
# Forward pass (mirrors ConvMixer.forward)
# ----------------------------------------------------------------------------
def convmixer_forward(params, inputs_nchw, labels, patch_size, kernel_size):
    B, _, H, W = inputs_nchw.shape
    p = patch_size
    Hp, Wp = H // p, W // p
    hidden = params["emb_w"].shape[1]

    # x = bn(gelu(emb_conv(inputs)))
    patches, _ = extract_patches_embed(inputs_nchw, p)
    scale, shift = bn_fuse(*params["bn"])
    x = fused_matmul_gelu_bn(patches, params["emb_w"], params["emb_b"], scale, shift)
    x = x.reshape(B, Hp, Wp, hidden)                     # NHWC bf16, no W padding yet

    # Mixer layers.  Inter-layer layout is the W-padded "window" layout
    # (B, Hp, Wpad, C); junk columns [Wp:Wpad) pass through the pointwise
    # stage untouched and are dropped by the next layer's single pad / the
    # final pooling slice.
    for lp in params["layers"]:
        # h = bn1(gelu(depthconv(x))) + x   (fused, tap-unrolled conv)
        s1, t1 = bn_fuse(*lp["bn1"])
        h = depthconv_gelu_bn_residual(x, lp["dw_w"], lp["dw_b"], s1, t1,
                                       kernel_size, Wp)       # (B, Hp, Wpad, C)
        Bh, Hh, Wpd, _ = h.shape
        # x = bn2(gelu(pointconv(h)))  — runs over all rows incl. junk columns.
        s2, t2 = bn_fuse(*lp["bn2"])
        h2 = fused_matmul_gelu_bn(h.reshape(Bh * Hh * Wpd, hidden),
                                  lp["pw_w"], lp["pw_b"], s2, t2)
        x = h2.reshape(Bh, Hh, Wpd, hidden)

    # avg_pool over the full (valid) spatial extent, then squeeze -> (B, hidden)
    pooled = jnp.mean(x[:, :, :Wp, :].astype(jnp.float32), axis=(1, 2))
    logits = matmul_bias(pooled, params["fc_w"], params["fc_b"])   # (B, classes) f32

    # loss = CrossEntropy(logits, labels); outputs = argmax(logits, dim=1)
    logp = jax.nn.log_softmax(logits, axis=-1)
    loss = -jnp.mean(jnp.take_along_axis(logp, labels[:, None], axis=1))
    preds = jnp.argmax(logits, axis=1)
    return loss, preds


# ----------------------------------------------------------------------------
if __name__ == "__main__":
    # Small, ConvMixer-consistent shapes.
    B, C, H, W = 2, 4, 16, 16
    patch_size, kernel_size = 4, 3
    hidden_dim, nlayer, num_classes = 32, 2, 10

    key = jax.random.PRNGKey(0)
    kx, kl, kp = jax.random.split(key, 3)
    x = jax.random.normal(kx, (B, C, H, W), jnp.float32)
    labels = jax.random.randint(kl, (B,), 0, num_classes)
    params = init_params(kp, C, hidden_dim, num_classes, nlayer, patch_size, kernel_size)

    fwd = jax.jit(functools.partial(convmixer_forward,
                                    patch_size=patch_size,
                                    kernel_size=kernel_size))
    loss, preds = fwd(params, x, labels)
    jax.block_until_ready((loss, preds))
    print("KERNEL_OK")
</pallas_src>

<mosaic_0001>
module attributes {stable_mosaic.version = 11 : i64} {
  func.func @_mm_gelu_bn_kernel(%arg0: i32, %arg1: memref<32x64xbf16, #tpu.memory_space<vmem>>, %arg2: memref<64x32xbf16, #tpu.memory_space<vmem>>, %arg3: memref<1x32xf32, #tpu.memory_space<vmem>>, %arg4: memref<1x32xf32, #tpu.memory_space<vmem>>, %arg5: memref<1x32xf32, #tpu.memory_space<vmem>>, %arg6: memref<32x32xbf16, #tpu.memory_space<vmem>>) attributes {dimension_semantics = [#tpu.dimension_semantics<parallel>], iteration_bounds = array<i64: 1>, scalar_prefetch = 0 : i64, scratch_operands = 0 : i64, tpu.core_type = #tpu.core_type<tc>, window_params = [{transform_indices = @transform_0, window_bounds = array<i64: 32, 64>}, {pipeline_mode = #tpu.pipeline_mode<synchronous>, transform_indices = @transform_1, window_bounds = array<i64: 64, 32>}, {pipeline_mode = #tpu.pipeline_mode<synchronous>, transform_indices = @transform_2, window_bounds = array<i64: 1, 32>}, {pipeline_mode = #tpu.pipeline_mode<synchronous>, transform_indices = @transform_3, window_bounds = array<i64: 1, 32>}, {pipeline_mode = #tpu.pipeline_mode<synchronous>, transform_indices = @transform_4, window_bounds = array<i64: 1, 32>}, {transform_indices = @transform_5, window_bounds = array<i64: 32, 32>}]} {
    %c0 = arith.constant 0 : index
    %c0_0 = arith.constant 0 : index
    %0 = vector.load %arg1[%c0, %c0_0] : memref<32x64xbf16, #tpu.memory_space<vmem>>, vector<32x64xbf16>
    %c0_1 = arith.constant 0 : index
    %c0_2 = arith.constant 0 : index
    %1 = vector.load %arg2[%c0_1, %c0_2] : memref<64x32xbf16, #tpu.memory_space<vmem>>, vector<64x32xbf16>
    %cst = arith.constant dense<0.000000e+00> : vector<32x32xf32>
    %2 = tpu.matmul %0, %1, %cst {dimension_numbers = #tpu.dot_dimension_numbers<[1], [0], [0], [1], [0, 0, 1, 1], [], []>} : vector<32x64xbf16>, vector<64x32xbf16>, vector<32x32xf32> -> vector<32x32xf32>
    %c0_3 = arith.constant 0 : index
    %c0_4 = arith.constant 0 : index
    %3 = vector.load %arg3[%c0_3, %c0_4] : memref<1x32xf32, #tpu.memory_space<vmem>>, vector<1x32xf32>
    %4 = vector.broadcast %3 : vector<1x32xf32> to vector<32x32xf32>
    %5 = arith.addf %2, %4 : vector<32x32xf32>
    %cst_5 = arith.constant 5.000000e-01 : f32
    %6 = vector.broadcast %cst_5 : f32 to vector<32x32xf32>
    %7 = arith.mulf %6, %5 : vector<32x32xf32>
    %cst_6 = arith.constant 4.471500e-02 : f32
    %8 = vector.broadcast %cst_6 : f32 to vector<32x32xf32>
    %9 = arith.mulf %8, %5 : vector<32x32xf32>
    %10 = arith.mulf %9, %5 : vector<32x32xf32>
    %11 = arith.mulf %10, %5 : vector<32x32xf32>
    %12 = arith.addf %5, %11 : vector<32x32xf32>
    %cst_7 = arith.constant 0.797884583 : f32
    %13 = vector.broadcast %cst_7 : f32 to vector<32x32xf32>
    %14 = arith.mulf %13, %12 : vector<32x32xf32>
    %15 = math.tanh %14 : vector<32x32xf32>
    %cst_8 = arith.constant 1.000000e+00 : f32
    %16 = vector.broadcast %cst_8 : f32 to vector<32x32xf32>
    %17 = arith.addf %16, %15 : vector<32x32xf32>
    %18 = arith.mulf %7, %17 : vector<32x32xf32>
    %c0_9 = arith.constant 0 : index
    %c0_10 = arith.constant 0 : index
    %19 = vector.load %arg4[%c0_9, %c0_10] : memref<1x32xf32, #tpu.memory_space<vmem>>, vector<1x32xf32>
    %20 = vector.broadcast %19 : vector<1x32xf32> to vector<32x32xf32>
    %21 = arith.mulf %18, %20 : vector<32x32xf32>
    %c0_11 = arith.constant 0 : index
    %c0_12 = arith.constant 0 : index
    %22 = vector.load %arg5[%c0_11, %c0_12] : memref<1x32xf32, #tpu.memory_space<vmem>>, vector<1x32xf32>
    %23 = vector.broadcast %22 : vector<1x32xf32> to vector<32x32xf32>
    %24 = arith.addf %21, %23 : vector<32x32xf32>
    %25 = arith.truncf %24 : vector<32x32xf32> to vector<32x32xbf16>
    %c0_13 = arith.constant 0 : index
    %c0_14 = arith.constant 0 : index
    %26 = vector.load %arg6[%c0_13, %c0_14] : memref<32x32xbf16, #tpu.memory_space<vmem>>, vector<32x32xbf16>
    tpu.vector_store %arg6[%c0_13, %c0_14], %25 {strides = array<i32>} : memref<32x32xbf16, #tpu.memory_space<vmem>>, vector<32x32xbf16>,
    return
  }
  func.func @transform_0(%arg0: i32) -> (i32, i32) {
    %c0_i32 = arith.constant 0 : i32
    %c0_i32_0 = arith.constant 0 : i32
    return %arg0, %c0_i32 : i32, i32
  }
  func.func @transform_1(%arg0: i32) -> (i32, i32) {
    %c0_i32 = arith.constant 0 : i32
    %c0_i32_0 = arith.constant 0 : i32
    %c0_i32_1 = arith.constant 0 : i32
    return %c0_i32, %c0_i32_0 : i32, i32
  }
  func.func @transform_2(%arg0: i32) -> (i32, i32) {
    %c0_i32 = arith.constant 0 : i32
    %c0_i32_0 = arith.constant 0 : i32
    %c0_i32_1 = arith.constant 0 : i32
    return %c0_i32, %c0_i32_0 : i32, i32
  }
  func.func @transform_3(%arg0: i32) -> (i32, i32) {
    %c0_i32 = arith.constant 0 : i32
    %c0_i32_0 = arith.constant 0 : i32
    %c0_i32_1 = arith.constant 0 : i32
    return %c0_i32, %c0_i32_0 : i32, i32
  }
  func.func @transform_4(%arg0: i32) -> (i32, i32) {
    %c0_i32 = arith.constant 0 : i32
    %c0_i32_0 = arith.constant 0 : i32
    %c0_i32_1 = arith.constant 0 : i32
    return %c0_i32, %c0_i32_0 : i32, i32
  }
  func.func @transform_5(%arg0: i32) -> (i32, i32) {
    %c0_i32 = arith.constant 0 : i32
    %c0_i32_0 = arith.constant 0 : i32
    return %arg0, %c0_i32 : i32, i32
  }
}

module attributes {stable_mosaic.version = 11 : i64} {
  func.func @_conv_taps_kernel(%arg0: i32, %arg1: memref<1x56x32xbf16, #tpu.memory_space<vmem>>, %arg2: memref<9x32x32xbf16, #tpu.memory_space<vmem>>, %arg3: memref<1x32xf32, #tpu.memory_space<vmem>>, %arg4: memref<1x32xf32, #tpu.memory_space<vmem>>, %arg5: memref<1x32xf32, #tpu.memory_space<vmem>>, %arg6: memref<1x32x32xbf16, #tpu.memory_space<vmem>>) attributes {dimension_semantics = [#tpu.dimension_semantics<parallel>], iteration_bounds = array<i64: 2>, scalar_prefetch = 0 : i64, scratch_operands = 0 : i64, tpu.core_type = #tpu.core_type<tc>, window_params = [{transform_indices = @transform_0, window_bounds = array<i64: 1, 56, 32>}, {pipeline_mode = #tpu.pipeline_mode<synchronous>, transform_indices = @transform_1, window_bounds = array<i64: 9, 32, 32>}, {pipeline_mode = #tpu.pipeline_mode<synchronous>, transform_indices = @transform_2, window_bounds = array<i64: 1, 32>}, {pipeline_mode = #tpu.pipeline_mode<synchronous>, transform_indices = @transform_3, window_bounds = array<i64: 1, 32>}, {pipeline_mode = #tpu.pipeline_mode<synchronous>, transform_indices = @transform_4, window_bounds = array<i64: 1, 32>}, {transform_indices = @transform_5, window_bounds = array<i64: 1, 32, 32>}]} {
    %c0 = arith.constant 0 : index
    %c0_0 = arith.constant 0 : index
    %c0_1 = arith.constant 0 : index
    %0 = vector.load %arg1[%c0, %c0_0, %c0_1] : memref<1x56x32xbf16, #tpu.memory_space<vmem>>, vector<1x32x32xbf16>
    %1 = vector.shape_cast %0 : vector<1x32x32xbf16> to vector<32x32xbf16>
    %c0_2 = arith.constant 0 : index
    %c0_3 = arith.constant 0 : index
    %c0_4 = arith.constant 0 : index
    %2 = vector.load %arg2[%c0_2, %c0_3, %c0_4] : memref<9x32x32xbf16, #tpu.memory_space<vmem>>, vector<1x32x32xbf16>
    %3 = vector.shape_cast %2 : vector<1x32x32xbf16> to vector<32x32xbf16>
    %cst = arith.constant dense<0.000000e+00> : vector<32x32xf32>
    %4 = tpu.matmul %1, %3, %cst {dimension_numbers = #tpu.dot_dimension_numbers<[1], [0], [0], [1], [0, 0, 1, 1], [], []>} : vector<32x32xbf16>, vector<32x32xbf16>, vector<32x32xf32> -> vector<32x32xf32>
    %c0_5 = arith.constant 0 : index
    %c1 = arith.constant 1 : index
    %c0_6 = arith.constant 0 : index
    %5 = vector.load %arg1[%c0_5, %c1, %c0_6] : memref<1x56x32xbf16, #tpu.memory_space<vmem>>, vector<1x32x32xbf16>
    %6 = vector.shape_cast %5 : vector<1x32x32xbf16> to vector<32x32xbf16>
    %c1_7 = arith.constant 1 : index
    %c0_8 = arith.constant 0 : index
    %c0_9 = arith.constant 0 : index
    %7 = vector.load %arg2[%c1_7, %c0_8, %c0_9] : memref<9x32x32xbf16, #tpu.memory_space<vmem>>, vector<1x32x32xbf16>
    %8 = vector.shape_cast %7 : vector<1x32x32xbf16> to vector<32x32xbf16>
    %cst_10 = arith.constant dense<0.000000e+00> : vector<32x32xf32>
    %9 = tpu.matmul %6, %8, %cst_10 {dimension_numbers = #tpu.dot_dimension_numbers<[1], [0], [0], [1], [0, 0, 1, 1], [], []>} : vector<32x32xbf16>, vector<32x32xbf16>, vector<32x32xf32> -> vector<32x32xf32>
    %10 = arith.addf %4, %9 : vector<32x32xf32>
    %c0_11 = arith.constant 0 : index
    %c2 = arith.constant 2 : index
    %c0_12 = arith.constant 0 : index
    %11 = vector.load %arg1[%c0_11, %c2, %c0_12] : memref<1x56x32xbf16, #tpu.memory_space<vmem>>, vector<1x32x32xbf16>
    %12 = vector.shape_cast %11 : vector<1x32x32xbf16> to vector<32x32xbf16>
    %c2_13 = arith.constant 2 : index
    %c0_14 = arith.constant 0 : index
    %c0_15 = arith.constant 0 : index
    %13 = vector.load %arg2[%c2_13, %c0_14, %c0_15] : memref<9x32x32xbf16, #tpu.memory_space<vmem>>, vector<1x32x32xbf16>
    %14 = vector.shape_cast %13 : vector<1x32x32xbf16> to vector<32x32xbf16>
    %cst_16 = arith.constant dense<0.000000e+00> : vector<32x32xf32>
    %15 = tpu.matmul %12, %14, %cst_16 {dimension_numbers = #tpu.dot_dimension_numbers<[1], [0], [0], [1], [0, 0, 1, 1], [], []>} : vector<32x32xbf16>, vector<32x32xbf16>, vector<32x32xf32> -> vector<32x32xf32>
    %16 = arith.addf %10, %15 : vector<32x32xf32>
    %c0_17 = arith.constant 0 : index
    %c8 = arith.constant 8 : index
    %c0_18 = arith.constant 0 : index
    %17 = vector.load %arg1[%c0_17, %c8, %c0_18] : memref<1x56x32xbf16, #tpu.memory_space<vmem>>, vector<1x32x32xbf16>
    %18 = vector.shape_cast %17 : vector<1x32x32xbf16> to vector<32x32xbf16>
    %c3 = arith.constant 3 : index
    %c0_19 = arith.constant 0 : index
    %c0_20 = arith.constant 0 : index
    %19 = vector.load %arg2[%c3, %c0_19, %c0_20] : memref<9x32x32xbf16, #tpu.memory_space<vmem>>, vector<1x32x32xbf16>
    %20 = vector.shape_cast %19 : vector<1x32x32xbf16> to vector<32x32xbf16>
    %cst_21 = arith.constant dense<0.000000e+00> : vector<32x32xf32>
    %21 = tpu.matmul %18, %20, %cst_21 {dimension_numbers = #tpu.dot_dimension_numbers<[1], [0], [0], [1], [0, 0, 1, 1], [], []>} : vector<32x32xbf16>, vector<32x32xbf16>, vector<32x32xf32> -> vector<32x32xf32>
    %22 = arith.addf %16, %21 : vector<32x32xf32>
    %c0_22 = arith.constant 0 : index
    %c9 = arith.constant 9 : index
    %c0_23 = arith.constant 0 : index
    %23 = vector.load %arg1[%c0_22, %c9, %c0_23] : memref<1x56x32xbf16, #tpu.memory_space<vmem>>, vector<1x32x32xbf16>
    %24 = vector.shape_cast %23 : vector<1x32x32xbf16> to vector<32x32xbf16>
    %c4 = arith.constant 4 : index
    %c0_24 = arith.constant 0 : index
    %c0_25 = arith.constant 0 : index
    %25 = vector.load %arg2[%c4, %c0_24, %c0_25] : memref<9x32x32xbf16, #tpu.memory_space<vmem>>, vector<1x32x32xbf16>
    %26 = vector.shape_cast %25 : vector<1x32x32xbf16> to vector<32x32xbf16>
    %cst_26 = arith.constant dense<0.000000e+00> : vector<32x32xf32>
    %27 = tpu.matmul %24, %26, %cst_26 {dimension_numbers = #tpu.dot_dimension_numbers<[1], [0], [0], [1], [0, 0, 1, 1], [], []>} : vector<32x32xbf16>, vector<32x32xbf16>, vector<32x32xf32> -> vector<32x32xf32>
    %28 = arith.addf %22, %27 : vector<32x32xf32>
    %c0_27 = arith.constant 0 : index
    %c10 = arith.constant 10 : index
    %c0_28 = arith.constant 0 : index
    %29 = vector.load %arg1[%c0_27, %c10, %c0_28] : memref<1x56x32xbf16, #tpu.memory_space<vmem>>, vector<1x32x32xbf16>
    %30 = vector.shape_cast %29 : vector<1x32x32xbf16> to vector<32x32xbf16>
    %c5 = arith.constant 5 : index
    %c0_29 = arith.constant 0 : index
    %c0_30 = arith.constant 0 : index
    %31 = vector.load %arg2[%c5, %c0_29, %c0_30] : memref<9x32x32xbf16, #tpu.memory_space<vmem>>, vector<1x32x32xbf16>
    %32 = vector.shape_cast %31 : vector<1x32x32xbf16> to vector<32x32xbf16>
    %cst_31 = arith.constant dense<0.000000e+00> : vector<32x32xf32>
    %33 = tpu.matmul %30, %32, %cst_31 {dimension_numbers = #tpu.dot_dimension_numbers<[1], [0], [0], [1], [0, 0, 1, 1], [], []>} : vector<32x32xbf16>, vector<32x32xbf16>, vector<32x32xf32> -> vector<32x32xf32>
    %34 = arith.addf %28, %33 : vector<32x32xf32>
    %c0_32 = arith.constant 0 : index
    %c16 = arith.constant 16 : index
    %c0_33 = arith.constant 0 : index
    %35 = vector.load %arg1[%c0_32, %c16, %c0_33] : memref<1x56x32xbf16, #tpu.memory_space<vmem>>, vector<1x32x32xbf16>
    %36 = vector.shape_cast %35 : vector<1x32x32xbf16> to vector<32x32xbf16>
    %c6 = arith.constant 6 : index
    %c0_34 = arith.constant 0 : index
    %c0_35 = arith.constant 0 : index
    %37 = vector.load %arg2[%c6, %c0_34, %c0_35] : memref<9x32x32xbf16, #tpu.memory_space<vmem>>, vector<1x32x32xbf16>
    %38 = vector.shape_cast %37 : vector<1x32x32xbf16> to vector<32x32xbf16>
    %cst_36 = arith.constant dense<0.000000e+00> : vector<32x32xf32>
    %39 = tpu.matmul %36, %38, %cst_36 {dimension_numbers = #tpu.dot_dimension_numbers<[1], [0], [0], [1], [0, 0, 1, 1], [], []>} : vector<32x32xbf16>, vector<32x32xbf16>, vector<32x32xf32> -> vector<32x32xf32>
    %40 = arith.addf %34, %39 : vector<32x32xf32>
    %c0_37 = arith.constant 0 : index
    %c17 = arith.constant 17 : index
    %c0_38 = arith.constant 0 : index
    %41 = vector.load %arg1[%c0_37, %c17, %c0_38] : memref<1x56x32xbf16, #tpu.memory_space<vmem>>, vector<1x32x32xbf16>
    %42 = vector.shape_cast %41 : vector<1x32x32xbf16> to vector<32x32xbf16>
    %c7 = arith.constant 7 : index
    %c0_39 = arith.constant 0 : index
    %c0_40 = arith.constant 0 : index
    %43 = vector.load %arg2[%c7, %c0_39, %c0_40] : memref<9x32x32xbf16, #tpu.memory_space<vmem>>, vector<1x32x32xbf16>
    %44 = vector.shape_cast %43 : vector<1x32x32xbf16> to vector<32x32xbf16>
    %cst_41 = arith.constant dense<0.000000e+00> : vector<32x32xf32>
    %45 = tpu.matmul %42, %44, %cst_41 {dimension_numbers = #tpu.dot_dimension_numbers<[1], [0], [0], [1], [0, 0, 1, 1], [], []>} : vector<32x32xbf16>, vector<32x32xbf16>, vector<32x32xf32> -> vector<32x32xf32>
    %46 = arith.addf %40, %45 : vector<32x32xf32>
    %c0_42 = arith.constant 0 : index
    %c18 = arith.constant 18 : index
    %c0_43 = arith.constant 0 : index
    %47 = vector.load %arg1[%c0_42, %c18, %c0_43] : memref<1x56x32xbf16, #tpu.memory_space<vmem>>, vector<1x32x32xbf16>
    %48 = vector.shape_cast %47 : vector<1x32x32xbf16> to vector<32x32xbf16>
    %c8_44 = arith.constant 8 : index
    %c0_45 = arith.constant 0 : index
    %c0_46 = arith.constant 0 : index
    %49 = vector.load %arg2[%c8_44, %c0_45, %c0_46] : memref<9x32x32xbf16, #tpu.memory_space<vmem>>, vector<1x32x32xbf16>
    %50 = vector.shape_cast %49 : vector<1x32x32xbf16> to vector<32x32xbf16>
    %cst_47 = arith.constant dense<0.000000e+00> : vector<32x32xf32>
    %51 = tpu.matmul %48, %50, %cst_47 {dimension_numbers = #tpu.dot_dimension_numbers<[1], [0], [0], [1], [0, 0, 1, 1], [], []>} : vector<32x32xbf16>, vector<32x32xbf16>, vector<32x32xf32> -> vector<32x32xf32>
    %52 = arith.addf %46, %51 : vector<32x32xf32>
    %c0_48 = arith.constant 0 : index
    %c0_49 = arith.constant 0 : index
    %53 = vector.load %arg3[%c0_48, %c0_49] : memref<1x32xf32, #tpu.memory_space<vmem>>, vector<1x32xf32>
    %54 = vector.broadcast %53 : vector<1x32xf32> to vector<32x32xf32>
    %55 = arith.addf %52, %54 : vector<32x32xf32>
    %cst_50 = arith.constant 5.000000e-01 : f32
    %56 = vector.broadcast %cst_50 : f32 to vector<32x32xf32>
    %57 = arith.mulf %56, %55 : vector<32x32xf32>
    %cst_51 = arith.constant 4.471500e-02 : f32
    %58 = vector.broadcast %cst_51 : f32 to vector<32x32xf32>
    %59 = arith.mulf %58, %55 : vector<32x32xf32>
    %60 = arith.mulf %59, %55 : vector<32x32xf32>
    %61 = arith.mulf %60, %55 : vector<32x32xf32>
    %62 = arith.addf %55, %61 : vector<32x32xf32>
    %cst_52 = arith.constant 0.797884583 : f32
    %63 = vector.broadcast %cst_52 : f32 to vector<32x32xf32>
    %64 = arith.mulf %63, %62 : vector<32x32xf32>
    %65 = math.tanh %64 : vector<32x32xf32>
    %cst_53 = arith.constant 1.000000e+00 : f32
    %66 = vector.broadcast %cst_53 : f32 to vector<32x32xf32>
    %67 = arith.addf %66, %65 : vector<32x32xf32>
    %68 = arith.mulf %57, %67 : vector<32x32xf32>
    %c0_54 = arith.constant 0 : index
    %c0_55 = arith.constant 0 : index
    %69 = vector.load %arg4[%c0_54, %c0_55] : memref<1x32xf32, #tpu.memory_space<vmem>>, vector<1x32xf32>
    %70 = vector.broadcast %69 : vector<1x32xf32> to vector<32x32xf32>
    %71 = arith.mulf %68, %70 : vector<32x32xf32>
    %c0_56 = arith.constant 0 : index
    %c0_57 = arith.constant 0 : index
    %72 = vector.load %arg5[%c0_56, %c0_57] : memref<1x32xf32, #tpu.memory_space<vmem>>, vector<1x32xf32>
    %73 = vector.broadcast %72 : vector<1x32xf32> to vector<32x32xf32>
    %74 = arith.addf %71, %73 : vector<32x32xf32>
    %75 = arith.extf %24 : vector<32x32xbf16> to vector<32x32xf32>
    %76 = arith.addf %74, %75 : vector<32x32xf32>
    %77 = arith.truncf %76 : vector<32x32xf32> to vector<32x32xbf16>
    %c0_58 = arith.constant 0 : index
    %c0_59 = arith.constant 0 : index
    %c0_60 = arith.constant 0 : index
    %78 = vector.load %arg6[%c0_58, %c0_59, %c0_60] : memref<1x32x32xbf16, #tpu.memory_space<vmem>>, vector<1x32x32xbf16>
    %79 = vector.shape_cast %78 : vector<1x32x32xbf16> to vector<32x32xbf16>
    %80 = vector.shape_cast %77 : vector<32x32xbf16> to vector<1x32x32xbf16>
    tpu.vector_store %arg6[%c0_58, %c0_59, %c0_60], %80 {strides = array<i32>} : memref<1x32x32xbf16, #tpu.memory_space<vmem>>, vector<1x32x32xbf16>,
    return
  }
  func.func @transform_0(%arg0: i32) -> (i32, i32, i32) {
    %c0_i32 = arith.constant 0 : i32
    %c0_i32_0 = arith.constant 0 : i32
    %c0_i32_1 = arith.constant 0 : i32
    return %arg0, %c0_i32, %c0_i32_0 : i32, i32, i32
  }
  func.func @transform_1(%arg0: i32) -> (i32, i32, i32) {
    %c0_i32 = arith.constant 0 : i32
    %c0_i32_0 = arith.constant 0 : i32
    %c0_i32_1 = arith.constant 0 : i32
    %c0_i32_2 = arith.constant 0 : i32
    return %c0_i32, %c0_i32_0, %c0_i32_1 : i32, i32, i32
  }
  func.func @transform_2(%arg0: i32) -> (i32, i32) {
    %c0_i32 = arith.constant 0 : i32
    %c0_i32_0 = arith.constant 0 : i32
    %c0_i32_1 = arith.constant 0 : i32
    return %c0_i32, %c0_i32_0 : i32, i32
  }
  func.func @transform_3(%arg0: i32) -> (i32, i32) {
    %c0_i32 = arith.constant 0 : i32
    %c0_i32_0 = arith.constant 0 : i32
    %c0_i32_1 = arith.constant 0 : i32
    return %c0_i32, %c0_i32_0 : i32, i32
  }
  func.func @transform_4(%arg0: i32) -> (i32, i32) {
    %c0_i32 = arith.constant 0 : i32
    %c0_i32_0 = arith.constant 0 : i32
    %c0_i32_1 = arith.constant 0 : i32
    return %c0_i32, %c0_i32_0 : i32, i32
  }
  func.func @transform_5(%arg0: i32) -> (i32, i32, i32) {
    %c0_i32 = arith.constant 0 : i32
    %c0_i32_0 = arith.constant 0 : i32
    %c0_i32_1 = arith.constant 0 : i32
    return %arg0, %c0_i32, %c0_i32_0 : i32, i32, i32
  }
}

module attributes {stable_mosaic.version = 11 : i64} {
  func.func @_mm_gelu_bn_kernel(%arg0: i32, %arg1: memref<64x32xbf16, #tpu.memory_space<vmem>>, %arg2: memref<32x32xbf16, #tpu.memory_space<vmem>>, %arg3: memref<1x32xf32, #tpu.memory_space<vmem>>, %arg4: memref<1x32xf32, #tpu.memory_space<vmem>>, %arg5: memref<1x32xf32, #tpu.memory_space<vmem>>, %arg6: memref<64x32xbf16, #tpu.memory_space<vmem>>) attributes {dimension_semantics = [#tpu.dimension_semantics<parallel>], iteration_bounds = array<i64: 1>, scalar_prefetch = 0 : i64, scratch_operands = 0 : i64, tpu.core_type = #tpu.core_type<tc>, window_params = [{transform_indices = @transform_0, window_bounds = array<i64: 64, 32>}, {pipeline_mode = #tpu.pipeline_mode<synchronous>, transform_indices = @transform_1, window_bounds = array<i64: 32, 32>}, {pipeline_mode = #tpu.pipeline_mode<synchronous>, transform_indices = @transform_2, window_bounds = array<i64: 1, 32>}, {pipeline_mode = #tpu.pipeline_mode<synchronous>, transform_indices = @transform_3, window_bounds = array<i64: 1, 32>}, {pipeline_mode = #tpu.pipeline_mode<synchronous>, transform_indices = @transform_4, window_bounds = array<i64: 1, 32>}, {transform_indices = @transform_5, window_bounds = array<i64: 64, 32>}]} {
    %c0 = arith.constant 0 : index
    %c0_0 = arith.constant 0 : index
    %0 = vector.load %arg1[%c0, %c0_0] : memref<64x32xbf16, #tpu.memory_space<vmem>>, vector<64x32xbf16>
    %c0_1 = arith.constant 0 : index
    %c0_2 = arith.constant 0 : index
    %1 = vector.load %arg2[%c0_1, %c0_2] : memref<32x32xbf16, #tpu.memory_space<vmem>>, vector<32x32xbf16>
    %cst = arith.constant dense<0.000000e+00> : vector<64x32xf32>
    %2 = tpu.matmul %0, %1, %cst {dimension_numbers = #tpu.dot_dimension_numbers<[1], [0], [0], [1], [0, 0, 1, 1], [], []>} : vector<64x32xbf16>, vector<32x32xbf16>, vector<64x32xf32> -> vector<64x32xf32>
    %c0_3 = arith.constant 0 : index
    %c0_4 = arith.constant 0 : index
    %3 = vector.load %arg3[%c0_3, %c0_4] : memref<1x32xf32, #tpu.memory_space<vmem>>, vector<1x32xf32>
    %4 = vector.broadcast %3 : vector<1x32xf32> to vector<64x32xf32>
    %5 = arith.addf %2, %4 : vector<64x32xf32>
    %cst_5 = arith.constant 5.000000e-01 : f32
    %6 = vector.broadcast %cst_5 : f32 to vector<64x32xf32>
    %7 = arith.mulf %6, %5 : vector<64x32xf32>
    %cst_6 = arith.constant 4.471500e-02 : f32
    %8 = vector.broadcast %cst_6 : f32 to vector<64x32xf32>
    %9 = arith.mulf %8, %5 : vector<64x32xf32>
    %10 = arith.mulf %9, %5 : vector<64x32xf32>
    %11 = arith.mulf %10, %5 : vector<64x32xf32>
    %12 = arith.addf %5, %11 : vector<64x32xf32>
    %cst_7 = arith.constant 0.797884583 : f32
    %13 = vector.broadcast %cst_7 : f32 to vector<64x32xf32>
    %14 = arith.mulf %13, %12 : vector<64x32xf32>
    %15 = math.tanh %14 : vector<64x32xf32>
    %cst_8 = arith.constant 1.000000e+00 : f32
    %16 = vector.broadcast %cst_8 : f32 to vector<64x32xf32>
    %17 = arith.addf %16, %15 : vector<64x32xf32>
    %18 = arith.mulf %7, %17 : vector<64x32xf32>
    %c0_9 = arith.constant 0 : index
    %c0_10 = arith.constant 0 : index
    %19 = vector.load %arg4[%c0_9, %c0_10] : memref<1x32xf32, #tpu.memory_space<vmem>>, vector<1x32xf32>
    %20 = vector.broadcast %19 : vector<1x32xf32> to vector<64x32xf32>
    %21 = arith.mulf %18, %20 : vector<64x32xf32>
    %c0_11 = arith.constant 0 : index
    %c0_12 = arith.constant 0 : index
    %22 = vector.load %arg5[%c0_11, %c0_12] : memref<1x32xf32, #tpu.memory_space<vmem>>, vector<1x32xf32>
    %23 = vector.broadcast %22 : vector<1x32xf32> to vector<64x32xf32>
    %24 = arith.addf %21, %23 : vector<64x32xf32>
    %25 = arith.truncf %24 : vector<64x32xf32> to vector<64x32xbf16>
    %c0_13 = arith.constant 0 : index
    %c0_14 = arith.constant 0 : index
    %26 = vector.load %arg6[%c0_13, %c0_14] : memref<64x32xbf16, #tpu.memory_space<vmem>>, vector<64x32xbf16>
    tpu.vector_store %arg6[%c0_13, %c0_14], %25 {strides = array<i32>} : memref<64x32xbf16, #tpu.memory_space<vmem>>, vector<64x32xbf16>,
    return
  }
  func.func @transform_0(%arg0: i32) -> (i32, i32) {
    %c0_i32 = arith.constant 0 : i32
    %c0_i32_0 = arith.constant 0 : i32
    return %arg0, %c0_i32 : i32, i32
  }
  func.func @transform_1(%arg0: i32) -> (i32, i32) {
    %c0_i32 = arith.constant 0 : i32
    %c0_i32_0 = arith.constant 0 : i32
    %c0_i32_1 = arith.constant 0 : i32
    return %c0_i32, %c0_i32_0 : i32, i32
  }
  func.func @transform_2(%arg0: i32) -> (i32, i32) {
    %c0_i32 = arith.constant 0 : i32
    %c0_i32_0 = arith.constant 0 : i32
    %c0_i32_1 = arith.constant 0 : i32
    return %c0_i32, %c0_i32_0 : i32, i32
  }
  func.func @transform_3(%arg0: i32) -> (i32, i32) {
    %c0_i32 = arith.constant 0 : i32
    %c0_i32_0 = arith.constant 0 : i32
    %c0_i32_1 = arith.constant 0 : i32
    return %c0_i32, %c0_i32_0 : i32, i32
  }
  func.func @transform_4(%arg0: i32) -> (i32, i32) {
    %c0_i32 = arith.constant 0 : i32
    %c0_i32_0 = arith.constant 0 : i32
    %c0_i32_1 = arith.constant 0 : i32
    return %c0_i32, %c0_i32_0 : i32, i32
  }
  func.func @transform_5(%arg0: i32) -> (i32, i32) {
    %c0_i32 = arith.constant 0 : i32
    %c0_i32_0 = arith.constant 0 : i32
    return %arg0, %c0_i32 : i32, i32
  }
}

module attributes {stable_mosaic.version = 11 : i64} {
  func.func @_mm_bias_kernel(%arg0: i32, %arg1: memref<8x32xf32, #tpu.memory_space<vmem>>, %arg2: memref<32x10xf32, #tpu.memory_space<vmem>>, %arg3: memref<1x10xf32, #tpu.memory_space<vmem>>, %arg4: memref<8x10xf32, #tpu.memory_space<vmem>>) attributes {dimension_semantics = [#tpu.dimension_semantics<parallel>], iteration_bounds = array<i64: 1>, scalar_prefetch = 0 : i64, scratch_operands = 0 : i64, tpu.core_type = #tpu.core_type<tc>, window_params = [{transform_indices = @transform_0, window_bounds = array<i64: 8, 32>}, {pipeline_mode = #tpu.pipeline_mode<synchronous>, transform_indices = @transform_1, window_bounds = array<i64: 32, 10>}, {pipeline_mode = #tpu.pipeline_mode<synchronous>, transform_indices = @transform_2, window_bounds = array<i64: 1, 10>}, {transform_indices = @transform_3, window_bounds = array<i64: 8, 10>}]} {
    %c0 = arith.constant 0 : index
    %c0_0 = arith.constant 0 : index
    %0 = vector.load %arg1[%c0, %c0_0] : memref<8x32xf32, #tpu.memory_space<vmem>>, vector<8x32xf32>
    %c0_1 = arith.constant 0 : index
    %c0_2 = arith.constant 0 : index
    %1 = vector.load %arg2[%c0_1, %c0_2] : memref<32x10xf32, #tpu.memory_space<vmem>>, vector<32x10xf32>
    %cst = arith.constant dense<0.000000e+00> : vector<8x10xf32>
    %2 = tpu.matmul %0, %1, %cst {dimension_numbers = #tpu.dot_dimension_numbers<[1], [0], [0], [1], [0, 0, 1, 1], [], []>} : vector<8x32xf32>, vector<32x10xf32>, vector<8x10xf32> -> vector<8x10xf32>
    %c0_3 = arith.constant 0 : index
    %c0_4 = arith.constant 0 : index
    %3 = vector.load %arg3[%c0_3, %c0_4] : memref<1x10xf32, #tpu.memory_space<vmem>>, vector<1x10xf32>
    %4 = vector.broadcast %3 : vector<1x10xf32> to vector<8x10xf32>
    %5 = arith.addf %2, %4 : vector<8x10xf32>
    %c0_5 = arith.constant 0 : index
    %c0_6 = arith.constant 0 : index
    %6 = vector.load %arg4[%c0_5, %c0_6] : memref<8x10xf32, #tpu.memory_space<vmem>>, vector<8x10xf32>
    tpu.vector_store %arg4[%c0_5, %c0_6], %5 {strides = array<i32>} : memref<8x10xf32, #tpu.memory_space<vmem>>, vector<8x10xf32>,
    return
  }
  func.func @transform_0(%arg0: i32) -> (i32, i32) {
    %c0_i32 = arith.constant 0 : i32
    %c0_i32_0 = arith.constant 0 : i32
    return %arg0, %c0_i32 : i32, i32
  }
  func.func @transform_1(%arg0: i32) -> (i32, i32) {
    %c0_i32 = arith.constant 0 : i32
    %c0_i32_0 = arith.constant 0 : i32
    %c0_i32_1 = arith.constant 0 : i32
    return %c0_i32, %c0_i32_0 : i32, i32
  }
  func.func @transform_2(%arg0: i32) -> (i32, i32) {
    %c0_i32 = arith.constant 0 : i32
    %c0_i32_0 = arith.constant 0 : i32
    %c0_i32_1 = arith.constant 0 : i32
    return %c0_i32, %c0_i32_0 : i32, i32
  }
  func.func @transform_3(%arg0: i32) -> (i32, i32) {
    %c0_i32 = arith.constant 0 : i32
    %c0_i32_0 = arith.constant 0 : i32
    return %arg0, %c0_i32 : i32, i32
  }
}

</mosaic_0001>

<bundles_post_ra>
// kernel: convmixer_forward.6
= control target key start
LH: loop header
LB: loop body
LE: loop exit
PB: predicated region body
PF: predicated region fallthrough
CT: control target
= control target key end

     0   :  { %vm71_vm0 = vcmask 523264   ;;  %vm153_vm1 = vcmask 257024   ;;  %s282_s1 = inlined_call_operand.vmem [shape: bf16[64,32], index: 1, kind: input, shape index: {}]   ;;  %s283_s2 = inlined_call_operand.vmem [shape: f32[1,32], index: 2, kind: input, shape index: {}]   ;;  %s284_s3 = inlined_call_operand.vmem [shape: f32[1,32], index: 3, kind: input, shape index: {}]   ;;  %s285_s4 = inlined_call_operand.vmem [shape: f32[1,32], index: 4, kind: input, shape index: {}]   ;;  %s286_s0 = inlined_call_operand.vmem [shape: bf16[32,64], index: 0, kind: input, shape index: {}]   ;;  %s287_s5 = inlined_call_operand.vmem [shape: bf16[32,32], index: 5, kind: output, shape index: {}]  }
   0x1   :  { %v193_v0 = vld [vmem:[%s282_s1 + $0x18] sm:$0xff]  ;;  %v192_v1 = vld [vmem:[%s282_s1 + $0x10] sm:$0xff]  ;;  %v191_v2 = vld [vmem:[%s282_s1 + $0x8] sm:$0xff] }
   0x2   :  { %82 = vmatpush.bf16.msra.mxu0 %v193_v0  ;;  %194 = vmatpush.bf16.msra.mxu1 %v193_v0  ;;  %v190_v3 = vld [vmem:[%s282_s1] sm:$0xff]  ;;  %v189_v5 = vld [vmem:[%s286_s0 + $0x8] sm:$0xff] }
   0x3   :  { %v188_v4 = vld [vmem:[%s286_s0] sm:$0xff] }
   0x4   :  { %v198_v6 = vld [vmem:[%s283_s2] ss:$0 sm:$0xff] }
   0x5   :  { %v199_v34 = vld [vmem:[%s284_s3] ss:$0 sm:$0xff] }
   0x6   :  { %83 = vmatpush.bf16.msra.mxu0 %v192_v1  ;;  %195 = vmatpush.bf16.msra.mxu1 %v192_v1  ;;  %v200_v43 = vld [vmem:[%s285_s4] ss:$0 sm:$0xff] }
   0xa   :  { %84 = vmatpush.bf16.msra.mxu0 %v191_v2  ;;  %196 = vmatpush.bf16.msra.mxu1 %v191_v2 }
   0xe   :  { %85 = vmatpush.bf16.msra.mxu0 %v190_v3  ;;  %197 = vmatpush.bf16.msra.mxu1 %v190_v3 }
  0x11   :  { %186 = vmatmul.msk.bf16.vlgmr.msra.gmra.mxu0 %vm71_vm0, %v188_v4  ;;  %187 = vmatmul.msk.bf16.vlgmr.msra.gmra.mxu1 %vm71_vm0, %v189_v5 }
  0x8e   :  { %v87_v7 = vpop.f32.mrf.mxu0  ;;  %v92_v8 = vpop.f32.mrf.mxu1 }
  0x8f   :  { %v88_v9 = vadd.f32 %v198_v6, %v87_v7  ;;  %v93_v10 = vadd.f32 %v198_v6, %v92_v8 }
  0x91   :  { %v101_v11 = vmul.f32 0.044715, %v88_v9  ;;  %v103_v12 = vmul.f32 0.044715, %v93_v10  ;;  %v97_v36 = vmul.f32 0.5, %v88_v9  ;;  %v99_v40 = vmul.f32 0.5, %v93_v10 }
  0x93   :  { %v105_v13 = vmul.f32 %v101_v11, %v88_v9  ;;  %v107_v14 = vmul.f32 %v103_v12, %v93_v10 }
  0x95   :  { %v109_v15 = vmul.f32 %v105_v13, %v88_v9  ;;  %v111_v16 = vmul.f32 %v107_v14, %v93_v10 }
  0x96   :  { %v89_v17 = vpop.f32.mrf.mxu0  ;;  %v94_v18 = vpop.f32.mrf.mxu1 }
  0x97   :  { %v113_v19 = vadd.f32 %v109_v15, %v88_v9  ;;  %v115_v20 = vadd.f32 %v111_v16, %v93_v10  ;;  %v90_v21 = vadd.f32 %v198_v6, %v89_v17  ;;  %v95_v22 = vadd.f32 %v198_v6, %v94_v18 }
  0x99   :  { %v117_v23 = vmul.f32 0.7978846, %v113_v19  ;;  %v119_v24 = vmul.f32 0.7978846, %v115_v20  ;;  %v102_v25 = vmul.f32 0.044715, %v90_v21 }
  0x9a   :  { %v104_v26 = vmul.f32 0.044715, %v95_v22  ;;  %v98_v53 = vmul.f32 0.5, %v90_v21  ;;  %v100_v55 = vmul.f32 0.5, %v95_v22 }
  0x9b   :  { %201 = vtanh.f32 %v117_v23  ;;  %v106_v27 = vmul.f32 %v102_v25, %v90_v21 }
  0x9c   :  { %203 = vtanh.f32 %v119_v24  ;;  %v108_v28 = vmul.f32 %v104_v26, %v95_v22 }
  0x9d   :  { %v110_v29 = vmul.f32 %v106_v27, %v90_v21 }
  0x9e   :  { %v112_v30 = vmul.f32 %v108_v28, %v95_v22 }
  0x9f   :  { %v114_v31 = vadd.f32 %v110_v29, %v90_v21 }
  0xa0   :  { %v116_v32 = vadd.f32 %v112_v30, %v95_v22 }
  0xa1   :  { %v202_v33 = vpop.eup %201  ;;  %v118_v38 = vmul.f32 0.7978846, %v114_v31 }
  0xa2   :  { %v204_v35 = vpop.eup %203  ;;  %v125_v37 = vadd.f32 1.0, %v202_v33  ;;  %v120_v39 = vmul.f32 0.7978846, %v116_v32 }
  0xa3   :  { %v127_v41 = vadd.f32 1.0, %v204_v35  ;;  %205 = vtanh.f32 %v118_v38 }
  0xa4   :  { %v129_v42 = vmul.f32 %v125_v37, %v97_v36  ;;  %207 = vtanh.f32 %v120_v39 }
  0xa5   :  { %v131_v44 = vmul.f32 %v127_v41, %v99_v40 }
  0xa6   :  { %v137_v45 = vmul.f32 %v199_v34, %v129_v42 }
  0xa7   :  { %v139_v46 = vmul.f32 %v199_v34, %v131_v44 }
  0xa8   :  { %v145_v47 = vadd.f32 %v200_v43, %v137_v45 }
  0xa9   :  { %v147_v48 = vadd.f32 %v200_v43, %v139_v46  ;;  %v206_v49 = vpop.eup %205 }
  0xaa   :  { %v149_v50 = vpack.c.bf16 %v145_v47, %v145_v47  ;;  %v208_v51 = vpop.eup %207  ;;  %v126_v54 = vadd.f32 1.0, %v206_v49 }
  0xab   :  { %v151_v52 = vpack.c.bf16 %v147_v48, %v147_v48  ;;  %v128_v56 = vadd.f32 1.0, %v208_v51 }
  0xac   :  { %154 = vst.msk [vmem:[%s287_s5] sm:$0xf] %vm153_vm1, %v149_v50  ;;  %v130_v57 = vmul.f32 %v126_v54, %v98_v53 }
  0xad   :  { %156 = vst.msk [vmem:[%s287_s5 + $0x8] sm:$0xf] %vm153_vm1, %v151_v52  ;;  %v132_v58 = vmul.f32 %v128_v56, %v100_v55 }
  0xae   :  { %v138_v59 = vmul.f32 %v199_v34, %v130_v57 }
  0xaf   :  { %v140_v60 = vmul.f32 %v199_v34, %v132_v58 }
  0xb0   :  { %v146_v61 = vadd.f32 %v200_v43, %v138_v59 }
  0xb1   :  { %v148_v62 = vadd.f32 %v200_v43, %v140_v60 }
  0xb2   :  { %v150_v63 = vpack.c.bf16 %v146_v61, %v146_v61 }
  0xb3   :  { %v152_v0 = vpack.c.bf16 %v148_v62, %v148_v62 }
  0xb4   :  { %155 = vst.msk [vmem:[%s287_s5 + $0x4] sm:$0xf] %vm153_vm1, %v150_v63 }
  0xb5   :  { %157 = vst.msk [vmem:[%s287_s5 + $0xc] sm:$0xf] %vm153_vm1, %v152_v0 }

// kernel: convmixer_forward.8
= control target key start
LH: loop header
LB: loop body
LE: loop exit
PB: predicated region body
PF: predicated region fallthrough
CT: control target
= control target key end

     0   :  { %vm69_vm0 = vcmask 261120   ;;  %vm215_vm1 = vcmask 257024   ;;  %s431_s1 = inlined_call_operand.vmem [shape: bf16[32,32], index: 1, kind: input, shape index: {}]   ;;  %s432_s2 = inlined_call_operand.vmem [shape: f32[1,32], index: 2, kind: input, shape index: {}]   ;;  %s433_s3 = inlined_call_operand.vmem [shape: f32[1,32], index: 3, kind: input, shape index: {}]   ;;  %s434_s0 = inlined_call_operand.vmem [shape: bf16[64,32], index: 0, kind: input, shape index: {}]   ;;  %s435_s4 = inlined_call_operand.vmem [shape: f32[1,32], index: 4, kind: input, shape index: {}]   ;;  %s436_s5 = inlined_call_operand.vmem [shape: bf16[64,32], index: 5, kind: output, shape index: {}]  }
   0x1   :  { %v261_v0 = vld [vmem:[%s431_s1 + $0x8] sm:$0xff]  ;;  %v260_v1 = vld [vmem:[%s431_s1] sm:$0xff]  ;;  %v258_v4 = vld [vmem:[%s434_s0 + $0x10] sm:$0xff] }
   0x2   :  { %88 = vmatpush.bf16.msra.mxu0 %v261_v0  ;;  %262 = vmatpush.bf16.msra.mxu1 %v261_v0  ;;  %v256_v2 = vld [vmem:[%s434_s0] sm:$0xff]  ;;  %v257_v3 = vld [vmem:[%s434_s0 + $0x8] sm:$0xff]  ;;  %v259_v5 = vld [vmem:[%s434_s0 + $0x18] sm:$0xff] }
   0x3   :  { %263 = vmatpush.bf16.msra.mxu2 %v261_v0  ;;  %264 = vmatpush.bf16.msra.mxu3 %v261_v0  ;;  %v268_v6 = vld [vmem:[%s432_s2] ss:$0 sm:$0xff] }
   0x4   :  { %v365_v57 = vld [vmem:[%s433_s3] ss:$0 sm:$0xff] }
   0x5   :  { %v371_v0 = vld [vmem:[%s435_s4] ss:$0 sm:$0xff] }
   0x6   :  { %89 = vmatpush.bf16.msra.mxu0 %v260_v1  ;;  %265 = vmatpush.bf16.msra.mxu1 %v260_v1 }
   0x7   :  { %266 = vmatpush.bf16.msra.mxu2 %v260_v1  ;;  %267 = vmatpush.bf16.msra.mxu3 %v260_v1 }
   0x9   :  { %252 = vmatmul.msk.bf16.vlgmr.msra.gmra.mxu0 %vm69_vm0, %v256_v2  ;;  %253 = vmatmul.msk.bf16.vlgmr.msra.gmra.mxu1 %vm69_vm0, %v257_v3 }
   0xa   :  { %254 = vmatmul.msk.bf16.vlgmr.msra.gmra.mxu2 %vm69_vm0, %v258_v4  ;;  %255 = vmatmul.msk.bf16.vlgmr.msra.gmra.mxu3 %vm69_vm0, %v259_v5 }
  0x86   :  { %v91_v7 = vpop.f32.mrf.mxu0  ;;  %v96_v8 = vpop.f32.mrf.mxu1 }
  0x87   :  { %v92_v9 = vadd.f32 %v268_v6, %v91_v7  ;;  %v97_v10 = vadd.f32 %v268_v6, %v96_v8 }
  0x89   :  { %v119_v11 = vmul.f32 0.044715, %v92_v9  ;;  %v121_v12 = vmul.f32 0.044715, %v97_v10  ;;  %v111_v51 = vmul.f32 0.5, %v92_v9  ;;  %v113_v58 = vmul.f32 0.5, %v97_v10 }
  0x8b   :  { %v127_v13 = vmul.f32 %v119_v11, %v92_v9  ;;  %v129_v14 = vmul.f32 %v121_v12, %v97_v10 }
  0x8d   :  { %v135_v15 = vmul.f32 %v127_v13, %v92_v9  ;;  %v137_v16 = vmul.f32 %v129_v14, %v97_v10  ;;  %v101_v17 = vpop.f32.mrf.mxu2  ;;  %v106_v18 = vpop.f32.mrf.mxu3 }
  0x8e   :  { %v102_v19 = vadd.f32 %v268_v6, %v101_v17  ;;  %v338_v20 = vadd.f32 %v268_v6, %v106_v18  ;;  %v93_v21 = vpop.f32.mrf.mxu0  ;;  %v98_v22 = vpop.f32.mrf.mxu1 }
  0x8f   :  { %v143_v23 = vadd.f32 %v135_v15, %v92_v9  ;;  %v145_v24 = vadd.f32 %v137_v16, %v97_v10  ;;  %v340_v25 = vadd.f32 %v268_v6, %v93_v21  ;;  %v342_v26 = vadd.f32 %v268_v6, %v98_v22 }
  0x90   :  { %v123_v27 = vmul.f32 0.044715, %v102_v19  ;;  %v125_v28 = vmul.f32 0.044715, %v338_v20  ;;  %v115_v10 = vmul.f32 0.5, %v102_v19  ;;  %v117_v15 = vmul.f32 0.5, %v338_v20 }
  0x91   :  { %v151_v29 = vmul.f32 0.7978846, %v143_v23  ;;  %v153_v30 = vmul.f32 0.7978846, %v145_v24  ;;  %v120_v33 = vmul.f32 0.044715, %v340_v25 }
  0x92   :  { %v131_v31 = vmul.f32 %v123_v27, %v102_v19  ;;  %v133_v32 = vmul.f32 %v125_v28, %v338_v20  ;;  %v122_v34 = vmul.f32 0.044715, %v342_v26  ;;  %v112_v22 = vmul.f32 0.5, %v340_v25 }
  0x93   :  { %271 = vtanh.f32 %v151_v29  ;;  %v128_v37 = vmul.f32 %v120_v33, %v340_v25 }
  0x94   :  { %273 = vtanh.f32 %v153_v30  ;;  %v139_v35 = vmul.f32 %v131_v31, %v102_v19  ;;  %v141_v36 = vmul.f32 %v133_v32, %v338_v20  ;;  %v130_v38 = vmul.f32 %v122_v34, %v342_v26 }
  0x95   :  { %v103_v39 = vpop.f32.mrf.mxu2  ;;  %v108_v40 = vpop.f32.mrf.mxu3  ;;  %v136_v43 = vmul.f32 %v128_v37, %v340_v25 }
  0x96   :  { %v147_v41 = vadd.f32 %v139_v35, %v102_v19  ;;  %v149_v42 = vadd.f32 %v141_v36, %v338_v20  ;;  %v353_v44 = vadd.f32 %v268_v6, %v103_v39  ;;  %v138_v45 = vmul.f32 %v130_v38, %v342_v26 }
  0x97   :  { %v356_v46 = vadd.f32 %v268_v6, %v108_v40  ;;  %v144_v49 = vadd.f32 %v136_v43, %v340_v25  ;;  %v114_v20 = vmul.f32 0.5, %v342_v26 }
  0x98   :  { %v155_v47 = vmul.f32 0.7978846, %v147_v41  ;;  %v157_v48 = vmul.f32 0.7978846, %v149_v42  ;;  %v146_v52 = vadd.f32 %v138_v45, %v342_v26  ;;  %v124_v53 = vmul.f32 0.044715, %v353_v44 }
  0x99   :  { %v272_v50 = vpop.eup %271  ;;  %v126_v54 = vmul.f32 0.044715, %v356_v46  ;;  %v152_v59 = vmul.f32 0.7978846, %v144_v49  ;;  %v116_v43 = vmul.f32 0.5, %v353_v44 }
  0x9a   :  { %v274_v55 = vpop.eup %273  ;;  %v167_v56 = vadd.f32 1.0, %v272_v50  ;;  %275 = vtanh.f32 %v155_v47  ;;  %v154_v61 = vmul.f32 0.7978846, %v146_v52  ;;  %v132_v62 = vmul.f32 %v124_v53, %v353_v44 }
  0x9b   :  { %v169_v60 = vadd.f32 1.0, %v274_v55  ;;  %277 = vtanh.f32 %v157_v48  ;;  %v134_v1 = vmul.f32 %v126_v54, %v356_v46  ;;  %v118_v48 = vmul.f32 0.5, %v356_v46 }
  0x9c   :  { %v175_v63 = vmul.f32 %v167_v56, %v111_v51  ;;  %279 = vtanh.f32 %v152_v59  ;;  %v140_v3 = vmul.f32 %v132_v62, %v353_v44 }
  0x9d   :  { %v177_v2 = vmul.f32 %v169_v60, %v113_v58  ;;  %281 = vtanh.f32 %v154_v61  ;;  %v142_v5 = vmul.f32 %v134_v1, %v356_v46 }
  0x9e   :  { %v187_v4 = vmul.f32 %v365_v57, %v175_v63  ;;  %v148_v7 = vadd.f32 %v140_v3, %v353_v44 }
  0x9f   :  { %v189_v6 = vmul.f32 %v365_v57, %v177_v2  ;;  %v150_v11 = vadd.f32 %v142_v5, %v356_v46 }
  0xa0   :  { %v276_v8 = vpop.eup %275  ;;  %v199_v9 = vadd.f32 %v371_v0, %v187_v4  ;;  %v156_v16 = vmul.f32 0.7978846, %v148_v7 }
  0xa1   :  { %v278_v12 = vpop.eup %277  ;;  %v201_v13 = vadd.f32 %v371_v0, %v189_v6  ;;  %v171_v14 = vadd.f32 1.0, %v276_v8  ;;  %v158_v23 = vmul.f32 0.7978846, %v150_v11 }
  0xa2   :  { %v280_v17 = vpop.eup %279  ;;  %v207_v18 = vpack.c.bf16 %v199_v9, %v199_v9  ;;  %v173_v21 = vadd.f32 1.0, %v278_v12  ;;  %283 = vtanh.f32 %v156_v16 }
  0xa3   :  { %v282_v24 = vpop.eup %281  ;;  %v209_v27 = vpack.c.bf16 %v201_v13, %v201_v13  ;;  %v179_v28 = vmul.f32 %v171_v14, %v115_v10  ;;  %v168_v29 = vadd.f32 1.0, %v280_v17  ;;  %285 = vtanh.f32 %v158_v23 }
  0xa4   :  { %216 = vst.msk [vmem:[%s436_s5] sm:$0xf] %vm215_vm1, %v207_v18  ;;  %v181_v19 = vmul.f32 %v173_v21, %v117_v15  ;;  %v170_v30 = vadd.f32 1.0, %v282_v24 }
  0xa5   :  { %218 = vst.msk [vmem:[%s436_s5 + $0x8] sm:$0xf] %vm215_vm1, %v209_v27  ;;  %v191_v25 = vmul.f32 %v365_v57, %v179_v28  ;;  %v176_v31 = vmul.f32 %v168_v29, %v112_v22 }
  0xa6   :  { %v193_v32 = vmul.f32 %v365_v57, %v181_v19  ;;  %v178_v33 = vmul.f32 %v170_v30, %v114_v20 }
  0xa7   :  { %v203_v34 = vadd.f32 %v371_v0, %v191_v25  ;;  %v188_v35 = vmul.f32 %v365_v57, %v176_v31 }
  0xa8   :  { %v205_v36 = vadd.f32 %v371_v0, %v193_v32  ;;  %v190_v26 = vmul.f32 %v365_v57, %v178_v33  ;;  %v284_v37 = vpop.eup %283 }
  0xa9   :  { %v211_v38 = vpack.c.bf16 %v203_v34, %v203_v34  ;;  %v200_v39 = vadd.f32 %v371_v0, %v188_v35  ;;  %v286_v40 = vpop.eup %285  ;;  %v172_v45 = vadd.f32 1.0, %v284_v37 }
  0xaa   :  { %v213_v41 = vpack.c.bf16 %v205_v36, %v205_v36  ;;  %v202_v42 = vadd.f32 %v371_v0, %v190_v26  ;;  %v174_v49 = vadd.f32 1.0, %v286_v40 }
  0xab   :  { %220 = vst.msk [vmem:[%s436_s5 + $0x10] sm:$0xf] %vm215_vm1, %v211_v38  ;;  %v208_v47 = vpack.c.bf16 %v200_v39, %v200_v39  ;;  %v180_v51 = vmul.f32 %v172_v45, %v116_v43 }
  0xac   :  { %222 = vst.msk [vmem:[%s436_s5 + $0x18] sm:$0xf] %vm215_vm1, %v213_v41  ;;  %v210_v50 = vpack.c.bf16 %v202_v42, %v202_v42  ;;  %v182_v44 = vmul.f32 %v174_v49, %v118_v48 }
  0xad   :  { %217 = vst.msk [vmem:[%s436_s5 + $0x4] sm:$0xf] %vm215_vm1, %v208_v47  ;;  %v192_v46 = vmul.f32 %v365_v57, %v180_v51 }
  0xae   :  { %219 = vst.msk [vmem:[%s436_s5 + $0xc] sm:$0xf] %vm215_vm1, %v210_v50  ;;  %v194_v52 = vmul.f32 %v365_v57, %v182_v44 }
  0xaf   :  { %v204_v53 = vadd.f32 %v371_v0, %v192_v46 }
  0xb0   :  { %v206_v54 = vadd.f32 %v371_v0, %v194_v52 }
  0xb1   :  { %v212_v55 = vpack.c.bf16 %v204_v53, %v204_v53 }
  0xb2   :  { %v214_v56 = vpack.c.bf16 %v206_v54, %v206_v54 }
  0xb3   :  { %221 = vst.msk [vmem:[%s436_s5 + $0x14] sm:$0xf] %vm215_vm1, %v212_v55 }
  0xb4   :  { %223 = vst.msk [vmem:[%s436_s5 + $0x1c] sm:$0xf] %vm215_vm1, %v214_v56 }

// kernel: convmixer_forward.7
= control target key start
LH: loop header
LB: loop body
LE: loop exit
PB: predicated region body
PF: predicated region fallthrough
CT: control target
= control target key end

     0   :  { %s1175_s18 = smov 0   ;;  %s1384_s0 = inlined_call_operand.vmem [shape: bf16[2,56,32], index: 0, kind: input, shape index: {}]   ;;  %s1385_s1 = inlined_call_operand.vmem [shape: bf16[9,32,32], index: 1, kind: input, shape index: {}]   ;;  %s1386_s2 = inlined_call_operand.vmem [shape: f32[1,32], index: 2, kind: input, shape index: {}]   ;;  %s1387_s3 = inlined_call_operand.vmem [shape: f32[1,32], index: 3, kind: input, shape index: {}]   ;;  %s1388_s4 = inlined_call_operand.vmem [shape: f32[1,32], index: 4, kind: input, shape index: {}]   ;;  %s1389_s5 = inlined_call_operand.vmem [shape: bf16[2,32,32], index: 5, kind: output, shape index: {}]  }
   0x1 LB: > { %s935_s19 = sadd.s32 4294967295, %s1143_s18   ;;  %p939_p0 = scmp.ge.s32.totalorder %s1143_s18, 1  ;;  %s1143_s18 = sphi %s1175_s18, %s15_s18  }
   0x2   : > { %p187_p1 = scmp.lt.s32.totalorder %s1143_s18, 3 }
   0x4   : > { %p188_p2 = pnand %p939_p0, %p187_p1 }
   0x5   : > { %p215_p3 = scmp.lt.s32.totalorder (!%p188_p2), %s935_s19, 1 }
   0x6   : > { %191 = sbr.rel (%p188_p2) target bundleno = 264 (0x108), region = 40 }
   0xb   : > { %v1075_v0 = vld [vmem:[%s1385_s1 + $0x18] sm:$0xff]  ;;  %v1077_v1 = vld [vmem:[%s1385_s1 + $0x28] sm:$0xff]  ;;  %v1074_v3 = vld [vmem:[%s1385_s1 + $0x10] sm:$0xff]  ;;  %s1391_s19 = smov (!%p215_p3, %s935_s19), 1  ;;  %vm253_vm0 = vsmask.f32 7424 }
   0xc   : > { %v1079_v2 = vld [vmem:[%s1385_s1 + $0x38] sm:$0xff]  ;;  %299 = vmatpush.bf16.msra.mxu0 %v1075_v0  ;;  %1115 = vmatpush.bf16.msra.mxu1 %v1075_v0  ;;  %v1073_v4 = vld [vmem:[%s1385_s1 + $0x8] sm:$0xff]  ;;  %v1076_v5 = vld [vmem:[%s1385_s1 + $0x20] sm:$0xff]  ;;  %s1117_s9 = smul.u32 28, %s1391_s19  ;;  %vm286_vm1 = vcmask 261120   ;;  %vm356_vm2 = vcmask 1046528  }
   0xd   : > { %386 = vmatpush.bf16.msra.mxu2 %v1077_v1  ;;  %437 = vmatpush.bf16.msra.mxu3 %v1079_v2  ;;  %v1078_v6 = vld [vmem:[%s1385_s1 + $0x30] sm:$0xff]  ;;  %v1081_v7 = vld [vmem:[%s1385_s1 + $0x48] sm:$0xff]  ;;  %v1088_v9 = vld [vmem:[%s1385_s1 + $0x78] sm:$0xff]  ;;  %vm875_vm3 = vcmask 257024  }
   0xe   : > { %v1085_v8 = vld [vmem:[%s1385_s1 + $0x68] sm:$0xff]  ;;  %s1219_s20 = scalar_lea.vmem %s1384_s0, %s1117_s9  ;;  %v1072_v10 = vld [vmem:[%s1385_s1] sm:$0xff]  ;;  %v1083_v50 = vld [vmem:[%s1385_s1 + $0x58] sm:$0xff] }
   0xf   : > { %v1080_v11 = vld [vmem:[%s1385_s1 + $0x40] sm:$0xff]  ;;  %v1231_v13 = vld [vmem:[%s1219_s20 + $0x8] sm:$0xff]   ;;  %v234_v14 = vld [vmem:[%s1219_s20 + $0x10] sm:$0x1] }
  0x10   : > { %300 = vmatpush.bf16.msra.mxu0 %v1074_v3  ;;  %1116 = vmatpush.bf16.msra.mxu1 %v1074_v3  ;;  %v1228_v12 = vld [vmem:[%s1219_s20] sm:$0xff]   ;;  %v262_v17 = vshll.u32 %v1231_v13, 16  ;;  %v249_v18 = vunpack.c.l.b16 %v234_v14  ;;  %v266_v21 = vshrl.u32 %v1231_v13, 16  ;;  %v358_v24 = vrot.slane %v1231_v13, 1  ;;  %v455_v26 = vld [vmem:[%s1219_s20 + $0x8] sm:$0xf] }
  0x11   : > { %387 = vmatpush.bf16.msra.mxu2 %v1076_v5  ;;  %v255_v15 = vshrl.u32 %v1228_v12, 16  ;;  %v257_v16 = vshll.u32 %v1228_v12, 16  ;;  %438 = vmatpush.bf16.msra.mxu3 %v1078_v6  ;;  %v347_v19 = vld [vmem:[%s1219_s20] sm:$0xe]  ;;  %v1094_v22 = vunpack.c.h.b16 %v1228_v12  ;;  %v454_v25 = vld [vmem:[%s1219_s20 + $0x4] sm:$0xf]  ;;  %v1097_v30 = vunpack.c.l.b16 %v1231_v13 }
  0x12   : > { %v1084_v20 = vld [vmem:[%s1385_s1 + $0x60] sm:$0xff]  ;;  %v354_v23 = vunpack.c.l.b16 %v347_v19  ;;  %v264_v28 = vrot.slane %v262_v17, 1  ;;  %v1246_v29 = vpack.c.b16 %v249_v18, %v249_v18  ;;  %v1250_v31 = vld [vmem:[%s1219_s20 + $0xc] sm:$0xf]  ;;  %v1253_v32 = vld [vmem:[%s1219_s20 + $0x10] sm:$0xf]  ;;  %v469_v34 = vunpack.c.l.b16 %v454_v25 }
  0x13   : > { %v259_v27 = vrot.slane %v257_v16, 1  ;;  %v1255_v35 = vunpack.c.l.b16 %v455_v26  ;;  %v471_v36 = vunpack.c.l.b16 %v1250_v31  ;;  %v411_v40 = vpack.c.b16 %v1097_v30, %v1094_v22  ;;  %v1090_v41 = vld [vmem:[%s1385_s1 + $0x88] sm:$0xff]  ;;  %v1087_v54 = vld [vmem:[%s1385_s1 + $0x70] sm:$0xff]  ;;  %v1089_v60 = vld [vmem:[%s1385_s1 + $0x80] sm:$0xff] }
  0x14   : > { %334 = vmatpush.bf16.msrb.mxu1 %v1073_v4  ;;  %521 = vmatpush.bf16.msrb.mxu0 %v1081_v7  ;;  %v355_v33 = vpack.c.b16 %v1094_v22, %v354_v23  ;;  %v1258_v38 = vor.u32 %v266_v21, %v264_v28  ;;  %v270_v39 = vshll.u32 %v1246_v29, 16  ;;  %v472_v43 = vunpack.c.l.b16 %v1253_v32  ;;  %v1082_v63 = vld [vmem:[%s1385_s1 + $0x50] sm:$0xff]  ;;  %v538_v30 = vld [vmem:[%s1219_s20 + $0x4] sm:$0xe] }
  0x15   : > { %627 = vmatpush.bf16.msrb.mxu2 %v1085_v8  ;;  %711 = vmatpush.bf16.msrb.mxu3 %v1088_v9  ;;  %v260_v37 = vor.u32 %v259_v27, %v255_v15  ;;  %v474_v44 = vpack.c.b16 %v1255_v35, %v469_v34  ;;  %v843_v45 = vunpack.c.l.bf16 %v454_v25  ;;  %v844_v48 = vunpack.c.l.bf16 %v455_v26  ;;  %v458_v2 = vld [vmem:[%s1219_s20 + $0x14] sm:$0x1]  ;;  %v1114_v14 = vld [vmem:[%s1219_s20 + $0xc] sm:$0xff]  ;;  %v648_v26 = vld [vmem:[%s1219_s20 + $0x18] sm:$0x1] }
  0x16   : > { %v357_v42 = vrot.slane %v355_v33, 1  ;;  %v272_v47 = vrot.slane %v270_v39, 1  ;;  %993 = vmatmul.msk.bf16.vlgmr.msra.gmra.mxu3 %vm286_vm1, %v411_v40  ;;  %v845_v49 = vunpack.c.l.bf16 %v1250_v31  ;;  %v1280_v52 = vpack.c.b16 %v472_v43, %v471_v36  ;;  %v1086_v18 = vld [vmem:[%s1219_s20 + $0x10] sm:$0xff]  ;;  %v1110_v34 = vld [vmem:[%s1219_s20 + $0x8] sm:$0xf0] }
  0x17   : > { %v265_v46 = vsel %vm253_vm0, %v260_v37, %v264_v28  ;;  %v480_v53 = vshll.u32 %v474_v44, 16  ;;  %v846_v56 = vunpack.c.l.bf16 %v1253_v32  ;;  %v854_v57 = vrot.slane %v843_v45, 1  ;;  %v1111_v37 = vld [vmem:[%s1219_s20 + $0x8] sm:$0xe] }
  0x18   : > { %335 = vmatpush.bf16.msrb.mxu1 %v1072_v10  ;;  %522 = vmatpush.bf16.msrb.mxu0 %v1080_v11  ;;  %v359_v51 = vsel %vm356_vm2, %v357_v42, %v358_v24  ;;  %v273_v55 = vsel %vm253_vm0, %v1258_v38, %v272_v47  ;;  %v855_v58 = vrot.slane %v844_v48, 1  ;;  %v857_v59 = vrot.slane %v845_v49, 1  ;;  %v593_v42 = vld [vmem:[%s1219_s20 + $0x14] sm:$0xf]  ;;  %s1071_s20 = sshll.u32 %s1391_s19, 4 }
  0x19   : > { %628 = vmatpush.bf16.msrb.mxu2 %v1084_v20  ;;  %955 = vmatmul.msk.bf16.vlgmr.msra.gmra.mxu0 %vm286_vm1, %v265_v46  ;;  %v859_v62 = vrot.slane %v846_v56, 1  ;;  %v478_v0 = vshrl.u32 %v474_v44, 16  ;;  %v482_v3 = vrot.slane %v480_v53, 1  ;;  %v485_v4 = vshll.u32 %v1280_v52, 16  ;;  %s1368_s23 = scalar_lea.vmem %s1389_s5, %s1071_s20 }
  0x1a   : > { %979 = vmatmul.msk.bf16.vlgmr.msra.gmra.mxu2 %vm286_vm1, %v359_v51  ;;  %956 = vmatmul.msk.bf16.vlgmr.msra.gmra.mxu1 %vm286_vm1, %v273_v55  ;;  %v1294_v61 = vsel %vm356_vm2, %v854_v57, %v855_v58  ;;  %v1300_v1 = vsel %vm356_vm2, %v855_v58, %v857_v59  ;;  %v847_v6 = vunpack.c.l.bf16 %v458_v2  ;;  %v360_v11 = vrot.slane %v1246_v29, 1 }
  0x1b   : > { %712 = vmatpush.bf16.msrb.mxu3 %v1087_v54  ;;  %v1305_v5 = vsel %vm356_vm2, %v857_v59, %v859_v62  ;;  %v483_v8 = vor.u32 %v482_v3, %v478_v0  ;;  %v487_v9 = vrot.slane %v485_v4, 1  ;;  %v473_v16 = vunpack.c.l.b16 %v458_v2 }
  0x1c   : > { %766 = vmatpush.bf16.msra.mxu0 %v1090_v41  ;;  %576 = vmatpush.bf16.msra.mxu1 %v1083_v50  ;;  %v861_v7 = vrot.slane %v847_v6, 1  ;;  %v361_v17 = vsel %vm356_vm2, %v358_v24, %v360_v11  ;;  %v675_v20 = vshll.u32 %v1086_v18, 16  ;;  %v489_v21 = vshrl.u32 %v1280_v52, 16 }
  0x1d   : > { %v488_v15 = vsel %vm253_vm0, %v483_v8, %v487_v9  ;;  %v476_v19 = vpack.c.b16 %v473_v16, %v473_v16  ;;  %v663_v28 = vunpack.c.l.b16 %v648_v26  ;;  %v679_v39 = vshrl.u32 %v1086_v18, 16 }
  0x1e   : > { %v1308_v10 = vsel %vm356_vm2, %v859_v62, %v861_v7  ;;  %v677_v23 = vrot.slane %v675_v20, 1  ;;  %v491_v24 = vor.u32 %v489_v21, %v487_v9  ;;  %v1112_v41 = vor.u32 %v1111_v37, %v1110_v34 }
  0x1f   : > { %v493_v22 = vshll.u32 %v476_v19, 16  ;;  %v666_v33 = vpack.c.b16 %v663_v28, %v663_v28  ;;  %v738_v46 = vrot.slane %v1086_v18, 1  ;;  %v600_v47 = vunpack.c.l.b16 %v593_v42 }
  0x20   : > { %767 = vmatpush.bf16.msra.mxu0 %v1089_v60  ;;  %577 = vmatpush.bf16.msra.mxu1 %v1082_v63  ;;  %v678_v27 = vsel %vm253_vm0, %v1258_v38, %v677_v23  ;;  %v545_v38 = vunpack.c.l.b16 %v538_v30  ;;  %v737_v45 = vrot.slane %v1112_v41, 1  ;;  %v548_v49 = vrot.slane %v1280_v52, 1  ;;  %v1126_v30 = vld [vmem:[%s1386_s2] ss:$0 sm:$0xff] }
  0x21   : > { %v495_v25 = vrot.slane %v493_v22, 1  ;;  %v683_v40 = vshll.u32 %v666_v33, 16  ;;  %v602_v51 = vpack.c.b16 %v600_v47, %v472_v43  ;;  %v550_v54 = vrot.slane %v476_v19, 1 }
  0x22   : > { %v546_v31 = vpack.c.b16 %v1255_v35, %v545_v38 }
  0x23   : > { %v496_v29 = vsel %vm253_vm0, %v491_v24, %v495_v25  ;;  %v685_v44 = vrot.slane %v683_v40, 1  ;;  %v551_v55 = vsel %vm356_vm2, %v548_v49, %v550_v54 }
  0x24   : > { %v547_v48 = vrot.slane %v546_v31, 1 }
  0x26   : > { %994 = vmatmul.msk.bf16.gmra.mxu3 %vm286_vm1, %v1114_v14  ;;  %v549_v53 = vsel %vm356_vm2, %v547_v48, %v548_v49 }
  0x29   : > { %1007 = vmatmul.msk.bf16.vlgmr.msrb.gmra.mxu0 %vm286_vm1, %v488_v15 }
  0x2a   : > { %980 = vmatmul.msk.bf16.gmra.mxu2 %vm286_vm1, %v361_v17  ;;  %965 = vmatmul.msk.bf16.vlgmr.msrb.gmra.mxu1 %vm286_vm1, %v1228_v12  ;;  %v601_v12 = vpack.c.b16 %v471_v36, %v1255_v35  ;;  %v681_v36 = vor.u32 %v679_v39, %v677_v23  ;;  %v740_v35 = vrot.slane %v666_v33, 1 }
  0x2c   : > { %v686_v50 = vsel %vm253_vm0, %v681_v36, %v685_v44  ;;  %v741_v52 = vsel %vm356_vm2, %v738_v46, %v740_v35 }
  0x36   : > { %1053 = vmatmul.msk.bf16.vlgmr.msrb.gmra.mxu3 %vm286_vm1, %v678_v27 }
  0x39   : > { %1008 = vmatmul.msk.bf16.gmra.mxu0 %vm286_vm1, %v496_v29 }
  0x3a   : > { %1035 = vmatmul.msk.bf16.vlgmr.msrb.gmra.mxu2 %vm286_vm1, %v601_v12  ;;  %966 = vmatmul.msk.bf16.gmra.mxu1 %vm286_vm1, %v1231_v13  ;;  %v739_v13 = vsel %vm356_vm2, %v737_v45, %v738_v46 }
  0x46   : > { %1054 = vmatmul.msk.bf16.gmra.mxu3 %vm286_vm1, %v686_v50 }
  0x49   : > { %1067 = vmatmul.msk.bf16.vlgmr.msra.gmra.mxu0 %vm286_vm1, %v739_v13 }
  0x4a   : > { %1036 = vmatmul.msk.bf16.gmra.mxu2 %vm286_vm1, %v602_v51  ;;  %1021 = vmatmul.msk.bf16.vlgmr.msra.gmra.mxu1 %vm286_vm1, %v549_v53 }
  0x59   : > { %1068 = vmatmul.msk.bf16.gmra.mxu0 %vm286_vm1, %v741_v52 }
  0x5a   : > { %1022 = vmatmul.msk.bf16.gmra.mxu1 %vm286_vm1, %v551_v55 }
  0x96   : > { %v302_v32 = vpop.f32.mrf.mxu0 }
  0x97   : > { %v307_v43 = vpop.f32.mrf.mxu1 }
  0x99   : > { %v440_v58 = vpop.f32.mrf.mxu3 }
  0x9d   : > { %v389_v56 = vpop.f32.mrf.mxu2 }
  0x9e   : > { %v304_v57 = vpop.f32.mrf.mxu0 }
  0x9f   : > { %v309_v59 = vpop.f32.mrf.mxu1 }
  0xa1   : > { %v442_v0 = vpop.f32.mrf.mxu3 }
  0xa5   : > { %v391_v62 = vpop.f32.mrf.mxu2 }
  0xa6   : > { %v524_v60 = vpop.f32.mrf.mxu0 }
  0xa7   : > { %v337_v63 = vpop.f32.mrf.mxu1 }
  0xa8   : > { %v338_v11 = vadd.f32 %v337_v63, %v302_v32 }
  0xa9   : > { %v445_v6 = vpop.f32.mrf.mxu3 }
  0xaa   : > { %v399_v16 = vadd.f32 %v389_v56, %v338_v11 }
  0xac   : > { %v450_v19 = vadd.f32 %v440_v58, %v399_v16 }
  0xad   : > { %v394_v4 = vpop.f32.mrf.mxu2 }
  0xae   : > { %v526_v2 = vpop.f32.mrf.mxu0  ;;  %v534_v23 = vadd.f32 %v524_v60, %v450_v19 }
  0xaf   : > { %v339_v3 = vpop.f32.mrf.mxu1 }
  0xb0   : > { %v340_v18 = vadd.f32 %v339_v3, %v304_v57 }
  0xb1   : > { %v447_v14 = vpop.f32.mrf.mxu3 }
  0xb2   : > { %v400_v22 = vadd.f32 %v391_v62, %v340_v18 }
  0xb4   : > { %v451_v29 = vadd.f32 %v442_v0, %v400_v22 }
  0xb5   : > { %v396_v9 = vpop.f32.mrf.mxu2 }
  0xb6   : > { %v529_v7 = vpop.f32.mrf.mxu0  ;;  %v535_v38 = vadd.f32 %v526_v2, %v451_v29 }
  0xb7   : > { %v342_v8 = vpop.f32.mrf.mxu1 }
  0xb8   : > { %v343_v27 = vadd.f32 %v342_v8, %v307_v43 }
  0xb9   : > { %v714_v21 = vpop.f32.mrf.mxu3 }
  0xba   : > { %v401_v34 = vadd.f32 %v394_v4, %v343_v27 }
  0xbc   : > { %v452_v46 = vadd.f32 %v445_v6, %v401_v34 }
  0xbd   : > { %v630_v20 = vpop.f32.mrf.mxu2 }
  0xbe   : > { %v531_v15 = vpop.f32.mrf.mxu0  ;;  %v536_v51 = vadd.f32 %v529_v7, %v452_v46 }
  0xbf   : > { %v344_v17 = vpop.f32.mrf.mxu1 }
  0xc0   : > { %v345_v36 = vadd.f32 %v344_v17, %v309_v59 }
  0xc1   : > { %v716_v39 = vpop.f32.mrf.mxu3 }
  0xc2   : > { %v402_v49 = vadd.f32 %v396_v9, %v345_v36 }
  0xc4   : > { %v453_v58 = vadd.f32 %v447_v14, %v402_v49  ;;  %v1127_v14 = vld [vmem:[%s1387_s3] ss:$0 sm:$0xff] }
  0xc5   : > { %v632_v33 = vpop.f32.mrf.mxu2 }
  0xc6   : > { %v769_v24 = vpop.f32.mrf.mxu0  ;;  %v537_v2 = vadd.f32 %v531_v15, %v453_v58 }
  0xc7   : > { %v579_v25 = vpop.f32.mrf.mxu1 }
  0xc8   : > { %v589_v26 = vadd.f32 %v579_v25, %v534_v23  ;;  %v1128_v23 = vld [vmem:[%s1388_s4] ss:$0 sm:$0xff] }
  0xc9   : > { %v719_v32 = vpop.f32.mrf.mxu3 }
  0xca   : > { %v640_v28 = vadd.f32 %v630_v20, %v589_v26 }
  0xcc   : > { %v724_v12 = vadd.f32 %v714_v21, %v640_v28 }
  0xcd   : > { %v635_v53 = vpop.f32.mrf.mxu2 }
  0xce   : > { %v779_v37 = vadd.f32 %v769_v24, %v724_v12  ;;  %v771_v31 = vpop.f32.mrf.mxu0 }
  0xcf   : > { %v581_v40 = vpop.f32.mrf.mxu1 }
  0xd0   : > { %v787_v41 = vadd.f32 %v1126_v30, %v779_v37  ;;  %v590_v42 = vadd.f32 %v581_v40, %v535_v38 }
  0xd1   : > { %v721_v20 = vpop.f32.mrf.mxu3 }
  0xd2   : > { %v795_v44 = vmul.f32 0.044715, %v787_v41  ;;  %v641_v45 = vadd.f32 %v632_v33, %v590_v42  ;;  %v791_v18 = vmul.f32 0.5, %v787_v41 }
  0xd4   : > { %v799_v47 = vmul.f32 %v795_v44, %v787_v41  ;;  %v725_v48 = vadd.f32 %v716_v39, %v641_v45 }
  0xd5   : > { %v637_v8 = vpop.f32.mrf.mxu2 }
  0xd6   : > { %v803_v50 = vmul.f32 %v799_v47, %v787_v41  ;;  %v780_v13 = vadd.f32 %v771_v31, %v725_v48  ;;  %v774_v59 = vpop.f32.mrf.mxu0 }
  0xd7   : > { %v584_v35 = vpop.f32.mrf.mxu1 }
  0xd8   : > { %v807_v54 = vadd.f32 %v803_v50, %v787_v41  ;;  %v788_v52 = vadd.f32 %v1126_v30, %v780_v13  ;;  %v591_v55 = vadd.f32 %v584_v35, %v536_v51 }
  0xda   : > { %v811_v43 = vmul.f32 0.7978846, %v807_v54  ;;  %v796_v56 = vmul.f32 0.044715, %v788_v52  ;;  %v642_v57 = vadd.f32 %v635_v53, %v591_v55  ;;  %v792_v39 = vmul.f32 0.5, %v788_v52 }
  0xdc   : > { %1129 = vtanh.f32 %v811_v43  ;;  %v800_v60 = vmul.f32 %v796_v56, %v788_v52  ;;  %v726_v62 = vadd.f32 %v719_v32, %v642_v57 }
  0xde   : > { %v804_v63 = vmul.f32 %v800_v60, %v788_v52  ;;  %v781_v0 = vadd.f32 %v774_v59, %v726_v62  ;;  %v776_v24 = vpop.f32.mrf.mxu0 }
  0xdf   : > { %v586_v3 = vpop.f32.mrf.mxu1 }
  0xe0   : > { %v808_v4 = vadd.f32 %v804_v63, %v788_v52  ;;  %v789_v6 = vadd.f32 %v1126_v30, %v781_v0  ;;  %v592_v7 = vadd.f32 %v586_v3, %v537_v2 }
  0xe2   : > { %v1130_v9 = vpop.eup %1129  ;;  %v812_v11 = vmul.f32 0.7978846, %v808_v4  ;;  %v797_v16 = vmul.f32 0.044715, %v789_v6  ;;  %v643_v17 = vadd.f32 %v637_v8, %v592_v7  ;;  %v793_v48 = vmul.f32 0.5, %v789_v6 }
  0xe3   : > { %v819_v19 = vadd.f32 1.0, %v1130_v9 }
  0xe4   : > { %1131 = vtanh.f32 %v812_v11  ;;  %v801_v21 = vmul.f32 %v797_v16, %v789_v6  ;;  %v727_v15 = vadd.f32 %v721_v20, %v643_v17 }
  0xe5   : > { %v823_v22 = vmul.f32 %v819_v19, %v791_v18 }
  0xe6   : > { %v805_v25 = vmul.f32 %v801_v21, %v789_v6  ;;  %v782_v26 = vadd.f32 %v776_v24, %v727_v15 }
  0xe7   : > { %v831_v27 = vmul.f32 %v1127_v14, %v823_v22 }
  0xe8   : > { %v809_v28 = vadd.f32 %v805_v25, %v789_v6  ;;  %v790_v29 = vadd.f32 %v1126_v30, %v782_v26 }
  0xe9   : > { %v839_v12 = vadd.f32 %v1128_v23, %v831_v27 }
  0xea   : > { %v1132_v33 = vpop.eup %1131  ;;  %v813_v34 = vmul.f32 0.7978846, %v809_v28  ;;  %v798_v37 = vmul.f32 0.044715, %v790_v29  ;;  %v794_v52 = vmul.f32 0.5, %v790_v29 }
  0xeb   : > { %v867_v38 = vadd.f32 %v1294_v61, %v839_v12  ;;  %v820_v40 = vadd.f32 1.0, %v1132_v33 }
  0xec   : > { %1133 = vtanh.f32 %v813_v34  ;;  %v802_v41 = vmul.f32 %v798_v37, %v790_v29 }
  0xed   : > { %v871_v30 = vpack.c.bf16 %v867_v38, %v867_v38  ;;  %v824_v42 = vmul.f32 %v820_v40, %v792_v39 }
  0xee   : > { %v806_v31 = vmul.f32 %v802_v41, %v790_v29 }
  0xef   : > { %876 = vst.msk [vmem:[%s1368_s23] sm:$0xf] %vm875_vm3, %v871_v30  ;;  %v832_v36 = vmul.f32 %v1127_v14, %v824_v42 }
  0xf0   : > { %v810_v44 = vadd.f32 %v806_v31, %v790_v29 }
  0xf1   : > { %v840_v61 = vadd.f32 %v1128_v23, %v832_v36 }
  0xf2   : > { %v1134_v45 = vpop.eup %1133  ;;  %v814_v46 = vmul.f32 0.7978846, %v810_v44 }
  0xf3   : > { %v868_v47 = vadd.f32 %v1300_v1, %v840_v61  ;;  %v821_v49 = vadd.f32 1.0, %v1134_v45 }
  0xf4   : > { %1135 = vtanh.f32 %v814_v46 }
  0xf5   : > { %v872_v50 = vpack.c.bf16 %v868_v47, %v868_v47  ;;  %v825_v13 = vmul.f32 %v821_v49, %v793_v48 }
  0xf7   : > { %877 = vst.msk [vmem:[%s1368_s23 + $0x4] sm:$0xf] %vm875_vm3, %v872_v50  ;;  %v833_v51 = vmul.f32 %v1127_v14, %v825_v13 }
  0xf9   : > { %v841_v53 = vadd.f32 %v1128_v23, %v833_v51 }
  0xfa   : > { %v1136_v35 = vpop.eup %1135 }
  0xfb   : > { %v869_v54 = vadd.f32 %v1305_v5, %v841_v53  ;;  %v822_v55 = vadd.f32 1.0, %v1136_v35 }
  0xfd   : > { %v873_v32 = vpack.c.bf16 %v869_v54, %v869_v54  ;;  %v826_v43 = vmul.f32 %v822_v55, %v794_v52 }
  0xff   : > { %878 = vst.msk [vmem:[%s1368_s23 + $0x8] sm:$0xf] %vm875_vm3, %v873_v32  ;;  %v834_v1 = vmul.f32 %v1127_v14, %v826_v43 }
 0x101   : > { %v842_v56 = vadd.f32 %v1128_v23, %v834_v1 }
 0x103   : > { %v870_v57 = vadd.f32 %v1308_v10, %v842_v56 }
 0x105   : > { %v874_v58 = vpack.c.bf16 %v870_v57, %v870_v57 }
 0x107   : > { %879 = vst.msk [vmem:[%s1368_s23 + $0xc] sm:$0xf] %vm875_vm3, %v874_v58 }
 0x108 PF: > { %s15_s18 = sadd.s32 1, %s1143_s18  }
 0x109   : > { %p12_p4 = scmp.ge.s32.totalorder %s15_s18, 4  }
 0x10b   :  { %14 = sbr.rel (!%p12_p4) target bundleno = 1 (0x1), region = 78 }

// kernel: convmixer_forward.11
= control target key start
LH: loop header
LB: loop body
LE: loop exit
PB: predicated region body
PF: predicated region fallthrough
CT: control target
= control target key end

     0   :  { %vm23_vm0 = vcmask 261120   ;;  %vm47_vm1 = vcmask 80896   ;;  %s96_s1 = inlined_call_operand.vmem [shape: f32[32,10], index: 1, kind: input, shape index: {}]   ;;  %s97_s2 = inlined_call_operand.vmem [shape: f32[1,10], index: 2, kind: input, shape index: {}]   ;;  %s98_s0 = inlined_call_operand.vmem [shape: f32[8,32], index: 0, kind: input, shape index: {}]   ;;  %s99_s3 = inlined_call_operand.vmem [shape: f32[8,10], index: 3, kind: output, shape index: {}]  }
   0x1   :  { %v18_v0 = vld [vmem:[%s96_s1 + $0x18] sm:$0xff]  ;;  %v17_v1 = vld [vmem:[%s96_s1 + $0x10] sm:$0xff]  ;;  %v16_v2 = vld [vmem:[%s96_s1 + $0x8] sm:$0xff] }
   0x2   :  { %39 = vmatpush.msra.mxu0 %v18_v0  ;;  %v15_v3 = vld [vmem:[%s96_s1] sm:$0xff] }
   0x3   :  { %v14_v4 = vld [vmem:[%s98_s0] sm:$0xff] }
   0x4   :  { %40 = vmatpush.msra.mxu0 %v17_v1  ;;  %v54_v5 = vld [vmem:[%s97_s2] ss:$0 sm:$0xff] }
   0x6   :  { %41 = vmatpush.msra.mxu0 %v16_v2 }
   0x8   :  { %42 = vmatpush.msra.mxu0 %v15_v3 }
   0x9   :  { %53 = vmatmul.msk.f32.vlgmr.msra.gmra.mxu0 %vm23_vm0, %v14_v4 }
  0x86   :  { %v44_v6 = vpop.f32.mrf.mxu0 }
  0x87   :  { %v45_v7 = vadd.f32 %v54_v5, %v44_v6 }
  0x89   :  { %48 = vst.msk [vmem:[%s99_s3] sm:$0xff] %vm47_vm1, %v45_v7 }

</bundles_post_ra>
